<compile_context>
chip_gen: v6e
topology: v6e:2x2x1
jax: 0.10.0
libtpu: 0.0.40
codegen_flags: <defaults>
</compile_context>

<pallas_src>
import functools
import math

import numpy as np
import jax
import jax.numpy as jnp
from jax.experimental import pallas as pl
from jax.experimental.pallas import tpu as pltpu


def _round_up(x, m):
    return (x + m - 1) // m * m


# ---------------------------------------------------------------------------
# Kernel
# ---------------------------------------------------------------------------

def _conv_bn_silu_kernel(x_ref, w_ref, scale_ref, shift_ref, o_ref, *,
                         ksize, stride, tile_h, w_out, c_tile, dyn_rows):
    """One (batch, row-tile, cout-tile) grid step: KxK conv + folded BN + SiLU.

    x_ref:     (1, rows, W_in, C_in)  halo'd input row window (Element path), or
               (1, H_in, W_in, C_in)  whole padded image (fallback path)
    w_ref:     (K, K, C_in, c_tile)   dense (block-diag for groups) weight
    scale_ref: (1, c_tile)            folded eval-mode BN scale (f32)
    shift_ref: (1, c_tile)            folded BN shift (+ conv bias) (f32)
    o_ref:     (1, tile_h, w_out, c_tile)   bf16 output tile
    """
    ntok = tile_h * w_out
    if dyn_rows:
        r0 = pl.program_id(1) * (tile_h * stride)
    else:
        r0 = 0

    # K*K taps, each a (ntok, C_in) @ (C_in, c_tile) MXU matmul with f32
    # accumulation.  (The review's "fold taps into one (ntok, K*K*C_in)
    # contraction" needs an in-kernel lane-concat im2col; for tiny C_in that
    # costs ~K^2 XLU relayout passes while these layers are DMA-bound, so the
    # contiguous per-tap loads are kept.)
    acc = jnp.zeros((ntok, c_tile), jnp.float32)
    for kh in range(ksize):
        for kw in range(ksize):
            if stride == 1:
                patch = x_ref[0, pl.ds(r0 + kh, tile_h), pl.ds(kw, w_out), :]
            else:
                # TODO(synk): stride>1 strided taps are not exercised by the demo
                # and unvalidated on TPU; production downsampling convs should
                # use wrapper-side space-to-depth instead.
                patch = x_ref[0, pl.ds(r0 + kh, tile_h, stride),
                              pl.ds(kw, w_out, stride), :]
            patch = patch.reshape(ntok, patch.shape[-1])
            acc = acc + jnp.dot(patch, w_ref[kh, kw],
                                preferred_element_type=jnp.float32)

    y = acc * scale_ref[...] + shift_ref[...]     # folded eval-mode BN (f32)
    y = y * jax.nn.sigmoid(y)                     # SiLU (f32)
    o_ref[0] = y.reshape(tile_h, w_out, c_tile).astype(o_ref.dtype)


# ---------------------------------------------------------------------------
# Feature probe: Element-indexed overlapping windows + Buffered(1)
# ---------------------------------------------------------------------------

_ELEMENT_WINDOWS_OK = None


def _element_windows_supported():
    """Check that pl.Element halo windows + pl.Buffered(1) work on this setup."""
    global _ELEMENT_WINDOWS_OK
    if _ELEMENT_WINDOWS_OK is not None:
        return _ELEMENT_WINDOWS_OK
    try:
        x = jnp.arange(16 * 8 * 128, dtype=jnp.float32).reshape(16, 8, 128)
        s = jnp.full((8, 128), 2.0, jnp.float32)

        def k(x_ref, s_ref, o_ref):
            o_ref[0] = x_ref[...] + s_ref[...]

        out = pl.pallas_call(
            k,
            out_shape=jax.ShapeDtypeStruct((3, 6, 8, 128), jnp.float32),
            grid=(3,),
            in_specs=[
                pl.BlockSpec((pl.Element(6), 8, 128), lambda i: (i * 4, 0, 0)),
                pl.BlockSpec((8, 128), lambda i: (0, 0),
                             pipeline_mode=pl.Buffered(1)),
            ],
            out_specs=pl.BlockSpec((1, 6, 8, 128), lambda i: (i, 0, 0)),
        )(x, s)
        want = jnp.stack([x[0:6], x[4:10], x[8:14]]) + 2.0
        _ELEMENT_WINDOWS_OK = bool(jnp.allclose(out, want))
    except Exception:
        _ELEMENT_WINDOWS_OK = False
    return _ELEMENT_WINDOWS_OK


# ---------------------------------------------------------------------------
# Wrapper
# ---------------------------------------------------------------------------

def _hw_vmem_bytes():
    try:
        info = pltpu.get_tpu_info()
        return int(getattr(info, "vmem_capacity_bytes", 64 << 20))
    except Exception:
        return 64 << 20


def base_conv_forward(x_nchw, params, *, stride=1, target_tokens=None,
                      c_out_tile=None):
    """SiLU(BN(Conv2d(x))) for NCHW input; returns NCHW (bf16) output."""
    w_dense = params["w_dense"]                        # (K, K, C_in, C_pad)
    scale, shift = params["scale"], params["shift"]    # (1, C_pad) f32
    c_out = params["c_out"]
    ksize, _, c_in, c_pad = w_dense.shape
    pad = (ksize - 1) // 2
    b, cxi, h, w = x_nchw.shape
    assert cxi == c_in, (cxi, c_in)

    h_out = (h + 2 * pad - ksize) // stride + 1
    w_out = (w + 2 * pad - ksize) // stride + 1
    elt = jnp.dtype(w_dense.dtype).itemsize

    # Generation-aware VMEM budget / tile-token target
    # (v7x 64 MiB -> ~48 MiB, v5e/v6e 128 MiB -> ~96 MiB).
    vmem_phys = _hw_vmem_bytes()
    vmem_limit = int(vmem_phys * 3 // 4)
    if target_tokens is None:
        target_tokens = 4096 if vmem_phys >= (96 << 20) else 2048

    # Output-channel tiling: keep the resident weight tile modest (v7x); tn is a
    # multiple of 128 dividing c_pad.
    if c_out_tile is None:
        c_out_tile = c_pad if ksize * ksize * c_in * c_pad * elt <= (8 << 20) else 512
    tn = max(128, (min(c_out_tile, c_pad) // 128) * 128)
    while c_pad % tn:
        tn -= 128
    n_co = c_pad // tn

    # Sublane-aligned output width; cdiv-based row tiling sized for VMEM.
    w_out_pad = _round_up(w_out, 8)
    tile_h = max(1, min(h_out, max(1, target_tokens // w_out_pad)))
    lane_cin = _round_up(c_in, 128)   # VMEM lane padding of the input block

    def vmem_need(th):
        rows_ = (th - 1) * stride + ksize
        w_in_ = (w_out_pad - 1) * stride + ksize
        return (2 * rows_ * w_in_ * lane_cin * elt      # input window (x2 bufs)
                + 2 * th * w_out_pad * tn * elt         # bf16 out tile (x2 bufs)
                + 2 * ksize * ksize * c_in * tn * elt   # weight (<=2 bufs)
                + 2 * th * w_out_pad * tn * 4)          # f32 accumulator slack

    while tile_h > 1 and vmem_need(tile_h) > vmem_limit // 2:
        tile_h = max(1, tile_h // 2)

    n_tiles = int(pl.cdiv(h_out, tile_h))
    h_out_pad = n_tiles * tile_h
    rows = (tile_h - 1) * stride + ksize
    row_step = tile_h * stride

    # NCHW -> NHWC (+ bf16 cast) and spatial zero-pad: conv halo plus whatever
    # the cdiv / sublane padding of (h_out, w_out) requires.
    # TODO(synk): if the surrounding model runs NHWC/bf16 end-to-end, these two
    # layout passes disappear entirely.
    x = jnp.transpose(x_nchw, (0, 2, 3, 1)).astype(w_dense.dtype)
    need_h = (h_out_pad - 1) * stride + ksize
    need_w = (w_out_pad - 1) * stride + ksize
    extra_h = max(0, need_h - (h + 2 * pad))
    extra_w = max(0, need_w - (w + 2 * pad))
    x = jnp.pad(x, ((0, 0), (pad, pad + extra_h), (pad, pad + extra_w), (0, 0)))
    h_in_tot, w_in_tot = x.shape[1], x.shape[2]

    kernel_common = dict(ksize=ksize, stride=stride, tile_h=tile_h,
                         w_out=w_out_pad, c_tile=tn)
    params_resident = (n_co == 1)

    def build(element_windows):
        if element_windows:
            # Overlapping halo row windows straight out of HBM (no staging copy).
            x_spec = pl.BlockSpec(
                (1, pl.Element(rows), w_in_tot, c_in),
                lambda bi, ti, ci: (bi, ti * row_step, 0, 0))
            buf1 = {"pipeline_mode": pl.Buffered(1)} if params_resident else {}
        else:
            # Fallback: whole padded image per batch element resident in VMEM;
            # the kernel slices its row window dynamically.  Only viable for
            # moderate H*W, but guaranteed to lower.
            x_spec = pl.BlockSpec(
                (1, h_in_tot, w_in_tot, c_in),
                lambda bi, ti, ci: (bi, 0, 0, 0))
            buf1 = {}
        w_spec = pl.BlockSpec((ksize, ksize, c_in, tn),
                              lambda bi, ti, ci: (0, 0, 0, ci), **buf1)
        sc_spec = pl.BlockSpec((1, tn), lambda bi, ti, ci: (0, ci), **buf1)
        sh_spec = pl.BlockSpec((1, tn), lambda bi, ti, ci: (0, ci), **buf1)
        kernel = functools.partial(_conv_bn_silu_kernel,
                                   dyn_rows=not element_windows,
                                   **kernel_common)
        return pl.pallas_call(
            kernel,
            out_shape=jax.ShapeDtypeStruct(
                (b, h_out_pad, w_out_pad, c_pad), w_dense.dtype),
            grid=(b, n_tiles, n_co),
            in_specs=[x_spec, w_spec, sc_spec, sh_spec],
            out_specs=pl.BlockSpec((1, tile_h, w_out_pad, tn),
                                   lambda bi, ti, ci: (bi, ti, 0, ci)),
            compiler_params=pltpu.CompilerParams(
                dimension_semantics=("parallel", "parallel", "parallel"),
                vmem_limit_bytes=vmem_limit),
        )

    if _element_windows_supported():
        try:
            out = build(element_windows=True)(x, w_dense, scale, shift)
        except Exception:
            out = build(element_windows=False)(x, w_dense, scale, shift)
    else:
        out = build(element_windows=False)(x, w_dense, scale, shift)

    out = out[:, :h_out, :w_out, :c_out]      # drop cdiv / sublane / lane padding
    return jnp.transpose(out, (0, 3, 1, 2))   # back to NCHW (bf16)


# ---------------------------------------------------------------------------
# Parameter setup (deterministic, synthetic; folds BN / bias / groups offline)
# ---------------------------------------------------------------------------

def make_base_conv_params(key, c_in, c_out, ksize, *, groups=1, bias=False,
                          matmul_dtype=jnp.bfloat16, eps=1e-5):
    assert c_in % groups == 0 and c_out % groups == 0
    ks = jax.random.split(key, 6)
    fan_in = (c_in // groups) * ksize * ksize
    w = jax.random.normal(ks[0], (c_out, c_in // groups, ksize, ksize),
                          jnp.float32) / math.sqrt(fan_in)
    b_conv = (0.1 * jax.random.normal(ks[1], (c_out,), jnp.float32)
              if bias else jnp.zeros((c_out,), jnp.float32))
    gamma = 1.0 + 0.1 * jax.random.normal(ks[2], (c_out,), jnp.float32)
    beta = 0.1 * jax.random.normal(ks[3], (c_out,), jnp.float32)
    run_mean = 0.1 * jax.random.normal(ks[4], (c_out,), jnp.float32)
    run_var = jnp.abs(1.0 + 0.1 * jax.random.normal(ks[5], (c_out,), jnp.float32))

    # Eval-mode BN + conv bias folded into per-channel scale / shift.
    scale = gamma / jnp.sqrt(run_var + eps)
    shift = beta + (b_conv - run_mean) * scale

    # Grouped conv densified into a block-diagonal (K, K, C_in, C_out_pad)
    # weight; C_out (lane axis) zero-padded to a multiple of 128 for lane-dense
    # stores.
    # TODO(synk): for high group counts / depthwise convs densification inflates
    # weight FLOPs/DMA by `groups`; those layers want a per-group grid axis.
    c_pad = _round_up(c_out, 128)
    w_np = np.asarray(w)
    dense = np.zeros((ksize, ksize, c_in, c_pad), np.float32)
    cig, cog = c_in // groups, c_out // groups
    for g in range(groups):
        for oc in range(cog):
            o = g * cog + oc
            dense[:, :, g * cig:(g + 1) * cig, o] = np.transpose(w_np[o], (1, 2, 0))
    scale_p = np.zeros((1, c_pad), np.float32)
    shift_p = np.zeros((1, c_pad), np.float32)
    scale_p[0, :c_out] = np.asarray(scale)
    shift_p[0, :c_out] = np.asarray(shift)

    return {
        "w_dense": jnp.asarray(dense).astype(matmul_dtype),
        "scale": jnp.asarray(scale_p),
        "shift": jnp.asarray(shift_p),
        "c_out": c_out,
        # raw tensors kept for the pure-JAX reference
        "w_torch": w, "b_conv": b_conv, "gamma": gamma, "beta": beta,
        "run_mean": run_mean, "run_var": run_var, "eps": eps, "groups": groups,
    }


# ---------------------------------------------------------------------------
# Pure-JAX reference (same math / same matmul dtype) for a sanity check
# ---------------------------------------------------------------------------

def base_conv_reference(x_nchw, params, *, stride=1):
    dt = params["w_dense"].dtype
    w = params["w_torch"].astype(dt)
    x = x_nchw.astype(dt)
    ksize = w.shape[-1]
    pad = (ksize - 1) // 2
    y = jax.lax.conv_general_dilated(
        x, w, window_strides=(stride, stride),
        padding=((pad, pad), (pad, pad)),
        dimension_numbers=("NCHW", "OIHW", "NCHW"),
        feature_group_count=params["groups"],
        preferred_element_type=jnp.float32)
    y = y + params["b_conv"][None, :, None, None]
    inv = params["gamma"] / jnp.sqrt(params["run_var"] + params["eps"])
    y = (y - params["run_mean"][None, :, None, None]) * inv[None, :, None, None] \
        + params["beta"][None, :, None, None]
    return y * jax.nn.sigmoid(y)


# ---------------------------------------------------------------------------

if __name__ == "__main__":
    key = jax.random.PRNGKey(0)

    configs = [
        # (name,           B, C_in, H,  W,  C_out, K, stride, groups, c_out_tile)
        ("3x3_s1",         2, 4,    16, 16, 32,    3, 1,      1,      None),
        ("1x1_grouped",    2, 16,   8,  8,  32,    1, 1,      4,      None),
        ("3x3_odd_cotile", 2, 8,    13, 13, 160,   3, 1,      1,      128),
    ]
    for name, B, C_IN, H, W, C_OUT, K, S, G, CT in configs:
        key, pk, xk = jax.random.split(key, 3)
        params = make_base_conv_params(pk, C_IN, C_OUT, K, groups=G,
                                       bias=False, matmul_dtype=jnp.bfloat16)
        x = jax.random.normal(xk, (B, C_IN, H, W), jnp.float32)

        # Small token target so the demo exercises multiple overlapping
        # (Element-indexed) row tiles, cdiv padding and the C_out tile axis.
        out = base_conv_forward(x, params, stride=S, target_tokens=128,
                                c_out_tile=CT)
        out = jax.block_until_ready(out)

        ref = base_conv_reference(x, params, stride=S)
        assert out.shape == ref.shape, (name, out.shape, ref.shape)
        out_f32 = out.astype(jnp.float32)
        ref_f32 = ref.astype(jnp.bfloat16).astype(jnp.float32)  # kernel stores bf16
        max_err = float(jnp.max(jnp.abs(out_f32 - ref_f32)))
        assert jnp.allclose(out_f32, ref_f32, rtol=2e-2, atol=2e-2), (name, max_err)

    print("KERNEL_OK")
</pallas_src>

<mosaic_0001>
module attributes {stable_mosaic.version = 11 : i64} {
  func.func @_conv_bn_silu_kernel(%arg0: i32, %arg1: i32, %arg2: i32, %arg3: memref<1x18x18x4xbf16, #tpu.memory_space<vmem>>, %arg4: memref<3x3x4x128xbf16, #tpu.memory_space<vmem>>, %arg5: memref<1x128xf32, #tpu.memory_space<vmem>>, %arg6: memref<1x128xf32, #tpu.memory_space<vmem>>, %arg7: memref<1x8x16x128xbf16, #tpu.memory_space<vmem>>) attributes {dimension_semantics = [#tpu.dimension_semantics<parallel>, #tpu.dimension_semantics<parallel>, #tpu.dimension_semantics<parallel>], iteration_bounds = array<i64: 2, 2, 1>, scalar_prefetch = 0 : i64, scratch_operands = 0 : i64, tpu.core_type = #tpu.core_type<tc>, window_params = [{transform_indices = @transform_0, window_bounds = array<i64: 1, 18, 18, 4>}, {transform_indices = @transform_1, window_bounds = array<i64: 3, 3, 4, 128>}, {transform_indices = @transform_2, window_bounds = array<i64: 1, 128>}, {transform_indices = @transform_3, window_bounds = array<i64: 1, 128>}, {transform_indices = @transform_4, window_bounds = array<i64: 1, 8, 16, 128>}]} {
    %c8_i32 = arith.constant 8 : i32
    %0 = arith.muli %arg1, %c8_i32 : i32
    %cst = arith.constant 0.000000e+00 : f32
    %1 = vector.broadcast %cst : f32 to vector<128x128xf32>
    %c0_i32 = arith.constant 0 : i32
    %2 = arith.addi %0, %c0_i32 : i32
    %c0 = arith.constant 0 : index
    %3 = arith.index_cast %2 : i32 to index
    %c0_0 = arith.constant 0 : index
    %c0_1 = arith.constant 0 : index
    %4 = vector.load %arg3[%c0, %3, %c0_0, %c0_1] : memref<1x18x18x4xbf16, #tpu.memory_space<vmem>>, vector<1x8x16x4xbf16>
    %5 = vector.shape_cast %4 : vector<1x8x16x4xbf16> to vector<8x16x4xbf16>
    %6 = vector.shape_cast %5 : vector<8x16x4xbf16> to vector<128x4xbf16>
    %c0_2 = arith.constant 0 : index
    %c0_3 = arith.constant 0 : index
    %c0_4 = arith.constant 0 : index
    %c0_5 = arith.constant 0 : index
    %7 = vector.load %arg4[%c0_2, %c0_3, %c0_4, %c0_5] : memref<3x3x4x128xbf16, #tpu.memory_space<vmem>>, vector<1x1x4x128xbf16>
    %8 = vector.shape_cast %7 : vector<1x1x4x128xbf16> to vector<4x128xbf16>
    %cst_6 = arith.constant dense<0.000000e+00> : vector<128x128xf32>
    %9 = tpu.matmul %6, %8, %cst_6 {dimension_numbers = #tpu.dot_dimension_numbers<[1], [0], [0], [1], [0, 0, 1, 1], [], []>} : vector<128x4xbf16>, vector<4x128xbf16>, vector<128x128xf32> -> vector<128x128xf32>
    %10 = arith.addf %1, %9 : vector<128x128xf32>
    %c0_i32_7 = arith.constant 0 : i32
    %11 = arith.addi %0, %c0_i32_7 : i32
    %c0_8 = arith.constant 0 : index
    %12 = arith.index_cast %11 : i32 to index
    %c1 = arith.constant 1 : index
    %c0_9 = arith.constant 0 : index
    %13 = vector.load %arg3[%c0_8, %12, %c1, %c0_9] : memref<1x18x18x4xbf16, #tpu.memory_space<vmem>>, vector<1x8x16x4xbf16>
    %14 = vector.shape_cast %13 : vector<1x8x16x4xbf16> to vector<8x16x4xbf16>
    %15 = vector.shape_cast %14 : vector<8x16x4xbf16> to vector<128x4xbf16>
    %c0_10 = arith.constant 0 : index
    %c1_11 = arith.constant 1 : index
    %c0_12 = arith.constant 0 : index
    %c0_13 = arith.constant 0 : index
    %16 = vector.load %arg4[%c0_10, %c1_11, %c0_12, %c0_13] : memref<3x3x4x128xbf16, #tpu.memory_space<vmem>>, vector<1x1x4x128xbf16>
    %17 = vector.shape_cast %16 : vector<1x1x4x128xbf16> to vector<4x128xbf16>
    %cst_14 = arith.constant dense<0.000000e+00> : vector<128x128xf32>
    %18 = tpu.matmul %15, %17, %cst_14 {dimension_numbers = #tpu.dot_dimension_numbers<[1], [0], [0], [1], [0, 0, 1, 1], [], []>} : vector<128x4xbf16>, vector<4x128xbf16>, vector<128x128xf32> -> vector<128x128xf32>
    %19 = arith.addf %10, %18 : vector<128x128xf32>
    %c0_i32_15 = arith.constant 0 : i32
    %20 = arith.addi %0, %c0_i32_15 : i32
    %c0_16 = arith.constant 0 : index
    %21 = arith.index_cast %20 : i32 to index
    %c2 = arith.constant 2 : index
    %c0_17 = arith.constant 0 : index
    %22 = vector.load %arg3[%c0_16, %21, %c2, %c0_17] : memref<1x18x18x4xbf16, #tpu.memory_space<vmem>>, vector<1x8x16x4xbf16>
    %23 = vector.shape_cast %22 : vector<1x8x16x4xbf16> to vector<8x16x4xbf16>
    %24 = vector.shape_cast %23 : vector<8x16x4xbf16> to vector<128x4xbf16>
    %c0_18 = arith.constant 0 : index
    %c2_19 = arith.constant 2 : index
    %c0_20 = arith.constant 0 : index
    %c0_21 = arith.constant 0 : index
    %25 = vector.load %arg4[%c0_18, %c2_19, %c0_20, %c0_21] : memref<3x3x4x128xbf16, #tpu.memory_space<vmem>>, vector<1x1x4x128xbf16>
    %26 = vector.shape_cast %25 : vector<1x1x4x128xbf16> to vector<4x128xbf16>
    %cst_22 = arith.constant dense<0.000000e+00> : vector<128x128xf32>
    %27 = tpu.matmul %24, %26, %cst_22 {dimension_numbers = #tpu.dot_dimension_numbers<[1], [0], [0], [1], [0, 0, 1, 1], [], []>} : vector<128x4xbf16>, vector<4x128xbf16>, vector<128x128xf32> -> vector<128x128xf32>
    %28 = arith.addf %19, %27 : vector<128x128xf32>
    %c1_i32 = arith.constant 1 : i32
    %29 = arith.addi %0, %c1_i32 : i32
    %c0_23 = arith.constant 0 : index
    %30 = arith.index_cast %29 : i32 to index
    %c0_24 = arith.constant 0 : index
    %c0_25 = arith.constant 0 : index
    %31 = vector.load %arg3[%c0_23, %30, %c0_24, %c0_25] : memref<1x18x18x4xbf16, #tpu.memory_space<vmem>>, vector<1x8x16x4xbf16>
    %32 = vector.shape_cast %31 : vector<1x8x16x4xbf16> to vector<8x16x4xbf16>
    %33 = vector.shape_cast %32 : vector<8x16x4xbf16> to vector<128x4xbf16>
    %c1_26 = arith.constant 1 : index
    %c0_27 = arith.constant 0 : index
    %c0_28 = arith.constant 0 : index
    %c0_29 = arith.constant 0 : index
    %34 = vector.load %arg4[%c1_26, %c0_27, %c0_28, %c0_29] : memref<3x3x4x128xbf16, #tpu.memory_space<vmem>>, vector<1x1x4x128xbf16>
    %35 = vector.shape_cast %34 : vector<1x1x4x128xbf16> to vector<4x128xbf16>
    %cst_30 = arith.constant dense<0.000000e+00> : vector<128x128xf32>
    %36 = tpu.matmul %33, %35, %cst_30 {dimension_numbers = #tpu.dot_dimension_numbers<[1], [0], [0], [1], [0, 0, 1, 1], [], []>} : vector<128x4xbf16>, vector<4x128xbf16>, vector<128x128xf32> -> vector<128x128xf32>
    %37 = arith.addf %28, %36 : vector<128x128xf32>
    %c1_i32_31 = arith.constant 1 : i32
    %38 = arith.addi %0, %c1_i32_31 : i32
    %c0_32 = arith.constant 0 : index
    %39 = arith.index_cast %38 : i32 to index
    %c1_33 = arith.constant 1 : index
    %c0_34 = arith.constant 0 : index
    %40 = vector.load %arg3[%c0_32, %39, %c1_33, %c0_34] : memref<1x18x18x4xbf16, #tpu.memory_space<vmem>>, vector<1x8x16x4xbf16>
    %41 = vector.shape_cast %40 : vector<1x8x16x4xbf16> to vector<8x16x4xbf16>
    %42 = vector.shape_cast %41 : vector<8x16x4xbf16> to vector<128x4xbf16>
    %c1_35 = arith.constant 1 : index
    %c1_36 = arith.constant 1 : index
    %c0_37 = arith.constant 0 : index
    %c0_38 = arith.constant 0 : index
    %43 = vector.load %arg4[%c1_35, %c1_36, %c0_37, %c0_38] : memref<3x3x4x128xbf16, #tpu.memory_space<vmem>>, vector<1x1x4x128xbf16>
    %44 = vector.shape_cast %43 : vector<1x1x4x128xbf16> to vector<4x128xbf16>
    %cst_39 = arith.constant dense<0.000000e+00> : vector<128x128xf32>
    %45 = tpu.matmul %42, %44, %cst_39 {dimension_numbers = #tpu.dot_dimension_numbers<[1], [0], [0], [1], [0, 0, 1, 1], [], []>} : vector<128x4xbf16>, vector<4x128xbf16>, vector<128x128xf32> -> vector<128x128xf32>
    %46 = arith.addf %37, %45 : vector<128x128xf32>
    %c1_i32_40 = arith.constant 1 : i32
    %47 = arith.addi %0, %c1_i32_40 : i32
    %c0_41 = arith.constant 0 : index
    %48 = arith.index_cast %47 : i32 to index
    %c2_42 = arith.constant 2 : index
    %c0_43 = arith.constant 0 : index
    %49 = vector.load %arg3[%c0_41, %48, %c2_42, %c0_43] : memref<1x18x18x4xbf16, #tpu.memory_space<vmem>>, vector<1x8x16x4xbf16>
    %50 = vector.shape_cast %49 : vector<1x8x16x4xbf16> to vector<8x16x4xbf16>
    %51 = vector.shape_cast %50 : vector<8x16x4xbf16> to vector<128x4xbf16>
    %c1_44 = arith.constant 1 : index
    %c2_45 = arith.constant 2 : index
    %c0_46 = arith.constant 0 : index
    %c0_47 = arith.constant 0 : index
    %52 = vector.load %arg4[%c1_44, %c2_45, %c0_46, %c0_47] : memref<3x3x4x128xbf16, #tpu.memory_space<vmem>>, vector<1x1x4x128xbf16>
    %53 = vector.shape_cast %52 : vector<1x1x4x128xbf16> to vector<4x128xbf16>
    %cst_48 = arith.constant dense<0.000000e+00> : vector<128x128xf32>
    %54 = tpu.matmul %51, %53, %cst_48 {dimension_numbers = #tpu.dot_dimension_numbers<[1], [0], [0], [1], [0, 0, 1, 1], [], []>} : vector<128x4xbf16>, vector<4x128xbf16>, vector<128x128xf32> -> vector<128x128xf32>
    %55 = arith.addf %46, %54 : vector<128x128xf32>
    %c2_i32 = arith.constant 2 : i32
    %56 = arith.addi %0, %c2_i32 : i32
    %c0_49 = arith.constant 0 : index
    %57 = arith.index_cast %56 : i32 to index
    %c0_50 = arith.constant 0 : index
    %c0_51 = arith.constant 0 : index
    %58 = vector.load %arg3[%c0_49, %57, %c0_50, %c0_51] : memref<1x18x18x4xbf16, #tpu.memory_space<vmem>>, vector<1x8x16x4xbf16>
    %59 = vector.shape_cast %58 : vector<1x8x16x4xbf16> to vector<8x16x4xbf16>
    %60 = vector.shape_cast %59 : vector<8x16x4xbf16> to vector<128x4xbf16>
    %c2_52 = arith.constant 2 : index
    %c0_53 = arith.constant 0 : index
    %c0_54 = arith.constant 0 : index
    %c0_55 = arith.constant 0 : index
    %61 = vector.load %arg4[%c2_52, %c0_53, %c0_54, %c0_55] : memref<3x3x4x128xbf16, #tpu.memory_space<vmem>>, vector<1x1x4x128xbf16>
    %62 = vector.shape_cast %61 : vector<1x1x4x128xbf16> to vector<4x128xbf16>
    %cst_56 = arith.constant dense<0.000000e+00> : vector<128x128xf32>
    %63 = tpu.matmul %60, %62, %cst_56 {dimension_numbers = #tpu.dot_dimension_numbers<[1], [0], [0], [1], [0, 0, 1, 1], [], []>} : vector<128x4xbf16>, vector<4x128xbf16>, vector<128x128xf32> -> vector<128x128xf32>
    %64 = arith.addf %55, %63 : vector<128x128xf32>
    %c2_i32_57 = arith.constant 2 : i32
    %65 = arith.addi %0, %c2_i32_57 : i32
    %c0_58 = arith.constant 0 : index
    %66 = arith.index_cast %65 : i32 to index
    %c1_59 = arith.constant 1 : index
    %c0_60 = arith.constant 0 : index
    %67 = vector.load %arg3[%c0_58, %66, %c1_59, %c0_60] : memref<1x18x18x4xbf16, #tpu.memory_space<vmem>>, vector<1x8x16x4xbf16>
    %68 = vector.shape_cast %67 : vector<1x8x16x4xbf16> to vector<8x16x4xbf16>
    %69 = vector.shape_cast %68 : vector<8x16x4xbf16> to vector<128x4xbf16>
    %c2_61 = arith.constant 2 : index
    %c1_62 = arith.constant 1 : index
    %c0_63 = arith.constant 0 : index
    %c0_64 = arith.constant 0 : index
    %70 = vector.load %arg4[%c2_61, %c1_62, %c0_63, %c0_64] : memref<3x3x4x128xbf16, #tpu.memory_space<vmem>>, vector<1x1x4x128xbf16>
    %71 = vector.shape_cast %70 : vector<1x1x4x128xbf16> to vector<4x128xbf16>
    %cst_65 = arith.constant dense<0.000000e+00> : vector<128x128xf32>
    %72 = tpu.matmul %69, %71, %cst_65 {dimension_numbers = #tpu.dot_dimension_numbers<[1], [0], [0], [1], [0, 0, 1, 1], [], []>} : vector<128x4xbf16>, vector<4x128xbf16>, vector<128x128xf32> -> vector<128x128xf32>
    %73 = arith.addf %64, %72 : vector<128x128xf32>
    %c2_i32_66 = arith.constant 2 : i32
    %74 = arith.addi %0, %c2_i32_66 : i32
    %c0_67 = arith.constant 0 : index
    %75 = arith.index_cast %74 : i32 to index
    %c2_68 = arith.constant 2 : index
    %c0_69 = arith.constant 0 : index
    %76 = vector.load %arg3[%c0_67, %75, %c2_68, %c0_69] : memref<1x18x18x4xbf16, #tpu.memory_space<vmem>>, vector<1x8x16x4xbf16>
    %77 = vector.shape_cast %76 : vector<1x8x16x4xbf16> to vector<8x16x4xbf16>
    %78 = vector.shape_cast %77 : vector<8x16x4xbf16> to vector<128x4xbf16>
    %c2_70 = arith.constant 2 : index
    %c2_71 = arith.constant 2 : index
    %c0_72 = arith.constant 0 : index
    %c0_73 = arith.constant 0 : index
    %79 = vector.load %arg4[%c2_70, %c2_71, %c0_72, %c0_73] : memref<3x3x4x128xbf16, #tpu.memory_space<vmem>>, vector<1x1x4x128xbf16>
    %80 = vector.shape_cast %79 : vector<1x1x4x128xbf16> to vector<4x128xbf16>
    %cst_74 = arith.constant dense<0.000000e+00> : vector<128x128xf32>
    %81 = tpu.matmul %78, %80, %cst_74 {dimension_numbers = #tpu.dot_dimension_numbers<[1], [0], [0], [1], [0, 0, 1, 1], [], []>} : vector<128x4xbf16>, vector<4x128xbf16>, vector<128x128xf32> -> vector<128x128xf32>
    %82 = arith.addf %73, %81 : vector<128x128xf32>
    %c0_75 = arith.constant 0 : index
    %c0_76 = arith.constant 0 : index
    %83 = vector.load %arg5[%c0_75, %c0_76] : memref<1x128xf32, #tpu.memory_space<vmem>>, vector<1x128xf32>
    %84 = vector.broadcast %83 : vector<1x128xf32> to vector<128x128xf32>
    %85 = arith.mulf %82, %84 : vector<128x128xf32>
    %c0_77 = arith.constant 0 : index
    %c0_78 = arith.constant 0 : index
    %86 = vector.load %arg6[%c0_77, %c0_78] : memref<1x128xf32, #tpu.memory_space<vmem>>, vector<1x128xf32>
    %87 = vector.broadcast %86 : vector<1x128xf32> to vector<128x128xf32>
    %88 = arith.addf %85, %87 : vector<128x128xf32>
    %89 = arith.negf %88 : vector<128x128xf32>
    %90 = math.exp %89 : vector<128x128xf32>
    %cst_79 = arith.constant 1.000000e+00 : f32
    %91 = vector.broadcast %cst_79 : f32 to vector<128x128xf32>
    %92 = arith.addf %91, %90 : vector<128x128xf32>
    %93 = arith.divf %91, %92 : vector<128x128xf32>
    %94 = arith.mulf %88, %93 : vector<128x128xf32>
    %95 = vector.shape_cast %94 : vector<128x128xf32> to vector<8x16x128xf32>
    %96 = arith.truncf %95 : vector<8x16x128xf32> to vector<8x16x128xbf16>
    %c0_80 = arith.constant 0 : index
    %c0_81 = arith.constant 0 : index
    %c0_82 = arith.constant 0 : index
    %c0_83 = arith.constant 0 : index
    %97 = vector.load %arg7[%c0_80, %c0_81, %c0_82, %c0_83] : memref<1x8x16x128xbf16, #tpu.memory_space<vmem>>, vector<1x8x16x128xbf16>
    %98 = vector.shape_cast %97 : vector<1x8x16x128xbf16> to vector<8x16x128xbf16>
    %99 = vector.shape_cast %96 : vector<8x16x128xbf16> to vector<1x8x16x128xbf16>
    tpu.vector_store %arg7[%c0_80, %c0_81, %c0_82, %c0_83], %99 {strides = array<i32>} : memref<1x8x16x128xbf16, #tpu.memory_space<vmem>>, vector<1x8x16x128xbf16>,
    return
  }
  func.func @transform_0(%arg0: i32, %arg1: i32, %arg2: i32) -> (i32, i32, i32, i32) {
    %c0_i32 = arith.constant 0 : i32
    %c0_i32_0 = arith.constant 0 : i32
    %c0_i32_1 = arith.constant 0 : i32
    %c0_i32_2 = arith.constant 0 : i32
    return %arg0, %c0_i32, %c0_i32_0, %c0_i32_1 : i32, i32, i32, i32
  }
  func.func @transform_1(%arg0: i32, %arg1: i32, %arg2: i32) -> (i32, i32, i32, i32) {
    %c0_i32 = arith.constant 0 : i32
    %c0_i32_0 = arith.constant 0 : i32
    %c0_i32_1 = arith.constant 0 : i32
    %c0_i32_2 = arith.constant 0 : i32
    return %c0_i32, %c0_i32_0, %c0_i32_1, %arg2 : i32, i32, i32, i32
  }
  func.func @transform_2(%arg0: i32, %arg1: i32, %arg2: i32) -> (i32, i32) {
    %c0_i32 = arith.constant 0 : i32
    %c0_i32_0 = arith.constant 0 : i32
    return %c0_i32, %arg2 : i32, i32
  }
  func.func @transform_3(%arg0: i32, %arg1: i32, %arg2: i32) -> (i32, i32) {
    %c0_i32 = arith.constant 0 : i32
    %c0_i32_0 = arith.constant 0 : i32
    return %c0_i32, %arg2 : i32, i32
  }
  func.func @transform_4(%arg0: i32, %arg1: i32, %arg2: i32) -> (i32, i32, i32, i32) {
    %c0_i32 = arith.constant 0 : i32
    %c0_i32_0 = arith.constant 0 : i32
    return %arg0, %arg1, %c0_i32, %arg2 : i32, i32, i32, i32
  }
}

</mosaic_0001>

<bundles_post_ra>
// kernel: tpu_custom_call.1
= control target key start
LH: loop header
LB: loop body
LE: loop exit
PB: predicated region body
PF: predicated region fallthrough
CT: control target
= control target key end

     0   :  { %9 = vsyncpa [#allocation3], 0  ;;  %s5376_s0 = inlined_call_operand.vmem [shape: bf16[2,18,18,4], index: 0, kind: input, shape index: {}]   ;;  %s5377_s1 = inlined_call_operand.vmem [shape: bf16[3,3,4,128], index: 1, kind: input, shape index: {}]   ;;  %s5378_s2 = inlined_call_operand.vmem [shape: f32[1,128], index: 2, kind: input, shape index: {}]   ;;  %s5379_s3 = inlined_call_operand.vmem [shape: f32[1,128], index: 3, kind: input, shape index: {}]   ;;  %s5380_s4 = inlined_call_operand.hbm [shape: bf16[2,16,16,128], index: 4, kind: output, shape index: {}]  }
   0x1   :  { %11 = vsyncpa [#allocation3 + $0x1], 0  ;;  %s4050_s15 = smov 0   ;;  %s4052_s16 = smov 0  }
   0x2   :  { %s4054_s17 = smov 0   ;;  %s4056_s18 = smov 0  }
   0x3   :  { %s4058_s19 = smov 0   ;;  %s4060_s20 = smov 0  }
   0x4   :  { %s4062_s21 = smov 0   ;;  %s4064_s22 = smov 0  }
   0x5 LB: > { %s3116_s23 = sadd.s32 4294967295, %s4020_s22   ;;  %s3117_s24 = sadd.s32 4294967294, %s4020_s22   ;;  %s4020_s22 = sphi %s4064_s22, %s17_s22   ;;  %s4016_s21 = sphi %s4062_s21, %s5437_s21   ;;  %s4012_s20 = sphi %s4060_s20, %s5436_s20   ;;  %s4008_s19 = sphi %s4058_s19, %s5435_s19   ;;  %s4004_s18 = sphi %s4056_s18, %s5434_s18   ;;  %s4000_s17 = sphi %s4054_s17, %s5433_s17   ;;  %s3996_s16 = sphi %s4052_s16, %s5432_s16   ;;  %s3992_s15 = sphi %s4050_s15, %s5431_s15  }
   0x6   : > { %s32_s25 = sadd.s32 1, %s4012_s20  ;;  %s36_s26 = sadd.s32 1, %s4016_s21 }
   0x7   : > { %p34_p0 = scmp.ge.s32.totalorder %s32_s25, 2  ;;  %p161_p1 = scmp.ne.s32.totalorder %s4000_s17, %s3996_s16 }
   0x8   : > { %p162_p2 = scmp.eq.s32.totalorder %s3116_s23, 3  ;;  %p167_p5 = scmp.ne.s32.totalorder %s3996_s16, %s3992_s15 }
   0x9   : > { %s5439_s25 = smov (%p34_p0, %s32_s25), 0  ;;  %s5441_s26 = smov (!%p34_p0, %s36_s26), %s4016_s21 }
   0xa   : > { %s145_s27 = ssub.s32 %s4012_s20, %s5439_s25  ;;  %p4101_p3 = por %p162_p2, %p161_p1 }
   0xb   : > { %p38_p4 = scmp.ge.s32.totalorder %s5441_s26, 2  ;;  %p168_p6 = scmp.eq.s32.totalorder %s3117_s24, 3 }
   0xc   : > { %p3123_p7 = scmp.ge.s32.totalorder %s4020_s22, 1  ;;  %p213_p9 = scmp.lt.s32.totalorder %s4020_s22, 5 }
   0xd   : > { %s5443_s26 = smov (%p38_p4, %s5441_s26), 0  ;;  %p4110_p8 = por %p168_p6, %p167_p5 }
   0xe   : > { %s144_s30 = ssub.s32 %s4016_s21, %s5443_s26  ;;  %s151_s5 = sadd.s32 1, %s4000_s17 }
   0xf   : > { %s146_s6 = sor.u32 %s145_s27, %s144_s30  ;;  %p214_p10 = pnand %p3123_p7, %p213_p9 }
  0x10   : > { %p149_p11 = scmp.eq.s32.totalorder %s146_s6, 0 }
  0x11   : > { %217 = sbr.rel (%p214_p10) target bundleno = 458 (0x1ca), region = 36 }
  0x12   : > { %s4119_s7 = scalar_select %p149_p11, %s4000_s17, %s151_s5  }
  0x16   : > { %v3129_v0 = vld [vmem:[%s5377_s1 + $0x2] sm:$0x3]  ;;  %vm541_vm0 = vcmask 1041408   ;;  %p249_p12 = scmp.lt.s32.totalorder %s4008_s19, 1  ;;  %v286_v2 = vld [vmem:[%s5377_s1] sm:$0x3] }
  0x17   : > { %3757 = vmatprep.subr.msk.bf16.mxu1 %vm541_vm0, %v3129_v0  ;;  %3756 = vmatprep.subr.msk.bf16.mxu0 %vm541_vm0, %v3129_v0  ;;  %v543_v1 = vsel %vm541_vm0, %v3129_v0, 0  ;;  %v3170_v3 = vld [vmem:[%s5377_s1 + $0x4] sm:$0x3]  ;;  %s3446_s23 = smul.u32 96, %s4004_s18  ;;  %vm295_vm1 = vsmask.f32 3328 }
  0x18   : > { %3755 = vmatpush3.bf16.msra.mxu1 %v543_v1  ;;  %3593 = vmatpush3.bf16.msra.mxu0 %v543_v1  ;;  %s250_s10 = scalar_select %p249_p12, %s4008_s19, 1  ;;  %vm296_vm2 = vsmask.f32 7440  ;;  %vm516_vm3 = vcmask 31744   ;;  %v4167_v15 = vsel %vm541_vm0, %v286_v2, 0  ;;  %v4187_v34 = vsel %vm541_vm0, %v3170_v3, 0 }
  0x19   : > { %3758 = vmatprep.subr.msk.bf16.mxu1 %vm541_vm0, %v286_v2  ;;  %3759 = vmatprep.subr.msk.bf16.mxu0 %vm541_vm0, %v3170_v3  ;;  %vm4182_vm4 = vmor %vm295_vm1, %vm296_vm2  ;;  %vm830_vm5 = vcmask 1042432   ;;  %vm831_vm6 = vcmask 1046532   ;;  %s246_s11 = sand.u32 1, %s3996_s16   ;;  %s3463_s14 = sshll.u32 %s4004_s18, 4 }
  0x1a   : > { %s3766_s24 = smul.u32 216, %s250_s10  ;;  %vm4318_vm7 = vmor %vm830_vm5, %vm831_vm6  ;;  %s3124_s12 = sshll.u32 %s246_s11, 6 }
  0x1b   : > { %s5291_s13 = scalar_lea.vmem [#allocation2], %s3124_s12  ;;  %s4022_s9 = smov [#allocation2]  }
  0x1c   : > { %s253_s5 = scalar_lea.vmem %s5376_s0, %s3766_s24  ;;  %s2987_s30 = sshll.u32 %s5291_s13, 4  ;;  %s5319_s30 = int_to_ptr.vmem [resolvable:$true] %s2987_s30 }
  0x1d   : > { %s4141_s6 = scalar_lea.vmem %s253_s5, %s3446_s23  ;;  %s3442_s23 = sshll.u32 %s4008_s19, 5 }
  0x1e   : > { %v4144_v4 = vld [vmem:[%s4141_s6] sm:$0xf]  ;;  %v4147_v5 = vld [vmem:[%s4141_s6 + $0x4] sm:$0xf]  ;;  %v4150_v6 = vld [vmem:[%s4141_s6 + $0x8] sm:$0x1]  ;;  %s2984_s24 = sadd.s32 %s3463_s14, %s3442_s23 }
  0x1f   : > { %v299_v7 = vshrl.u32 %v4144_v4, 16  ;;  %v302_v8 = vshll.u32 %v4144_v4, 16  ;;  %v308_v9 = vshll.u32 %v4147_v5, 16  ;;  %v312_v10 = vshrl.u32 %v4147_v5, 16  ;;  %v4157_v11 = vld [vmem:[%s4141_s6 + $0x30] sm:$0xf] }
  0x20   : > { %v318_v12 = vshll.u32 %v4150_v6, 16  ;;  %v4161_v13 = vld [vmem:[%s4141_s6 + $0x34] sm:$0xf]  ;;  %v4164_v14 = vld [vmem:[%s4141_s6 + $0x38] sm:$0x1]  ;;  %v395_v21 = vshrl.u32 %v4157_v11, 16 }
  0x21   : > { %v301_v16 = vrot.slane %v299_v7, 4  ;;  %v304_v17 = vrot.slane %v302_v8, 5  ;;  %v310_v18 = vrot.slane %v308_v9, 5  ;;  %v314_v19 = vrot.slane %v312_v10, 4  ;;  %v4175_v28 = vld [vmem:[%s4141_s6 + $0xc] sm:$0xf] }
  0x22   : > { %v320_v20 = vrot.slane %v318_v12, 5  ;;  %v398_v22 = vshll.u32 %v4157_v11, 16  ;;  %v404_v23 = vshll.u32 %v4161_v13, 16  ;;  %v408_v26 = vshrl.u32 %v4161_v13, 16  ;;  %v4178_v29 = vld [vmem:[%s4141_s6 + $0x10] sm:$0xf] }
  0x23   : > { %v305_v24 = vor.u32 %v304_v17, %v301_v16  ;;  %v315_v25 = vor.u32 %v314_v19, %v310_v18  ;;  %v414_v27 = vshll.u32 %v4164_v14, 16  ;;  %v397_v31 = vrot.slane %v395_v21, 4  ;;  %v4190_v40 = vld [vmem:[%s4141_s6 + $0x14] sm:$0x1]  ;;  %v4201_v52 = vld [vmem:[%s4141_s6 + $0x3c] sm:$0xf] }
  0x24   : > { %v400_v32 = vrot.slane %v398_v22, 5  ;;  %v406_v33 = vrot.slane %v404_v23, 5  ;;  %v410_v37 = vrot.slane %v408_v26, 4  ;;  %v323_v41 = vshrl.u32 %v4175_v28, 16  ;;  %v4205_v57 = vld [vmem:[%s4141_s6 + $0x40] sm:$0xf] }
  0x25   : > { %v306_v35 = vrot.slane %v305_v24, 4  ;;  %v316_v36 = vrot.slane %v315_v25, 4  ;;  %v416_v38 = vrot.slane %v414_v27, 5  ;;  %v326_v42 = vshll.u32 %v4175_v28, 16  ;;  %v4213_v62 = vld [vmem:[%s4141_s6 + $0x44] sm:$0x1] }
  0x26   : > { %v401_v39 = vor.u32 %v400_v32, %v397_v31  ;;  %v332_v43 = vshll.u32 %v4178_v29, 16  ;;  %v411_v46 = vor.u32 %v410_v37, %v406_v33  ;;  %v336_v47 = vshrl.u32 %v4178_v29, 16  ;;  %v4219_v3 = vld [vmem:[%s4141_s6 + $0x18] sm:$0xf]  ;;  %v4226_v19 = vld [vmem:[%s4141_s6 + $0x1c] sm:$0xf] }
  0x27   : > { %v311_v44 = vsel %vm4182_vm4, %v306_v35, %v310_v18  ;;  %v321_v45 = vsel %vm4182_vm4, %v316_v36, %v320_v20  ;;  %v325_v50 = vrot.slane %v323_v41, 4  ;;  %v328_v51 = vrot.slane %v326_v42, 5  ;;  %v4232_v23 = vld [vmem:[%s4141_s6 + $0x20] sm:$0x1]  ;;  %v4239_v32 = vld [vmem:[%s4141_s6 + $0x48] sm:$0xf] }
  0x28   : > { %v3130_v48 = vcombine.low %v311_v44, %v321_v45  ;;  %v402_v49 = vrot.slane %v401_v39, 4  ;;  %v412_v53 = vrot.slane %v411_v46, 4  ;;  %v334_v54 = vrot.slane %v332_v43, 5  ;;  %v4250_v44 = vld [vmem:[%s4141_s6 + $0x4c] sm:$0xf]  ;;  %s3443_s27 = sshll.u32 %s2984_s24, 6 }
  0x29   : > { %v338_v55 = vrot.slane %v336_v47, 4  ;;  %v342_v56 = vshll.u32 %v4190_v40, 16  ;;  %v838_v58 = vrot.slane %v4150_v6, 5  ;;  %v329_v60 = vor.u32 %v328_v51, %v325_v50  ;;  %s5317_s5 = scalar_lea.hbm %s5380_s4, %s3443_s27  ;;  %s3928_s8 = scalar_lea.vmem %s5319_s30, 1024 }
  0x2a   : > { %3594 = vmatprep.mubr.msk.bf16.mxu0 %vm516_vm3, %v3130_v48  ;;  %v407_v59 = vsel %vm4182_vm4, %v402_v49, %v406_v33  ;;  %v842_v61 = vrot.slane %v4178_v29, 5  ;;  %v417_v63 = vsel %vm4182_vm4, %v412_v53, %v416_v38  ;;  %v419_v2 = vshrl.u32 %v4201_v52, 16  ;;  %v4245_v38 = vld [vmem:[%s5377_s1 + $0x8] sm:$0x3]  ;;  %p3929_p13 = scmp.ne.s32.totalorder %s5319_s30, %s3928_s8  ;;  %s3932_s10 = sshll.u32 %s4022_s9, 4  ;;  %s3933_s10 = int_to_ptr.vmem [resolvable:$false] %s3932_s10 }
  0x2b   : > { %v339_v0 = vor.u32 %v338_v55, %v334_v54  ;;  %v344_v1 = vrot.slane %v342_v56, 5  ;;  %v3134_v7 = vcombine.low %v407_v59, %v417_v63  ;;  %v330_v8 = vrot.slane %v329_v60, 4  ;;  %v4263_v63 = vld [vmem:[%s4141_s6 + $0x24] sm:$0xf]  ;;  %s3934_s12 = scalar_lea.vmem %s3933_s10, 2048  ;;  %p3935_p2 = scmp.lt.s32.totalorder %s5319_s30, %s3933_s10 }
  0x2c   : > { %v422_v9 = vshll.u32 %v4201_v52, 16  ;;  %v428_v10 = vshll.u32 %v4205_v57, 16  ;;  %v421_v16 = vrot.slane %v419_v2, 4  ;;  %v432_v17 = vshrl.u32 %v4205_v57, 16  ;;  %p3930_p0 = pnand %p3929_p13, %p4101_p3  ;;  %p3936_p4 = scmp.lt.s32.totalorder %s3934_s12, %s3928_s8 }
  0x2d   : > { %v340_v12 = vrot.slane %v339_v0, 4  ;;  %v438_v18 = vshll.u32 %v4213_v62, 16  ;;  %3602 = vmatprep.mubr.msk.bf16.mxu1 %vm516_vm3, %v3134_v7  ;;  %v335_v20 = vsel %vm4182_vm4, %v330_v8, %v334_v54  ;;  %v347_v24 = vshrl.u32 %v4219_v3, 16  ;;  %v4257_v54 = vld [vmem:[%s4141_s6 + $0x50] sm:$0x1] }
  0x2e   : > { %v424_v21 = vrot.slane %v422_v9, 5  ;;  %v430_v22 = vrot.slane %v428_v10, 5  ;;  %v434_v26 = vrot.slane %v432_v17, 4  ;;  %v350_v31 = vshll.u32 %v4219_v3, 16  ;;  %v4271_v7 = vld [vmem:[%s4141_s6 + $0x28] sm:$0xf]  ;;  %p3931_p1 = pneg %p3930_p0  ;;  %p3937_p5 = por %p3936_p4, %p3935_p2 }
  0x2f   : > { %v345_v25 = vsel %vm4182_vm4, %v340_v12, %v344_v1  ;;  %v440_v27 = vrot.slane %v438_v18, 5  ;;  %v349_v36 = vrot.slane %v347_v24, 4  ;;  %v356_v37 = vshll.u32 %v4226_v19, 16  ;;  %v4276_v8 = vld [vmem:[%s5377_s1 + $0x6] sm:$0x3] }
  0x30   : > { %v3131_v33 = vcombine.low %v335_v20, %v345_v25  ;;  %v425_v35 = vor.u32 %v424_v21, %v421_v16  ;;  %v435_v39 = vor.u32 %v434_v26, %v430_v22  ;;  %v352_v41 = vrot.slane %v350_v31, 5  ;;  %v4280_v17 = vld [vmem:[%s4141_s6 + $0x2c] sm:$0x1]  ;;  %v4286_v24 = vld [vmem:[%s4141_s6 + $0x54] sm:$0xf]  ;;  %p3938_p6 = pnand %p3937_p5, %p3931_p1 }
  0x31   : > { %v360_v42 = vshrl.u32 %v4226_v19, 16  ;;  %v366_v43 = vshll.u32 %v4232_v23, 16  ;;  %v358_v46 = vrot.slane %v356_v37, 5  ;;  %v443_v47 = vshrl.u32 %v4239_v32, 16 }
  0x32   : > { %3595 = vmatmul.mubr.msk.bf16.vlgmr.msra.gmra.mxu0 %vm516_vm3, %v3131_v33  ;;  %v426_v45 = vrot.slane %v425_v35, 4  ;;  %v446_v48 = vshll.u32 %v4239_v32, 16  ;;  %v436_v49 = vrot.slane %v435_v39, 4  ;;  %v353_v50 = vor.u32 %v352_v41, %v349_v36  ;;  %v4292_v33 = vld [vmem:[%s4141_s6 + $0x58] sm:$0xf] }
  0x33   : > { %3629 = vmatpush3.bf16.msra.mxu0 %v4187_v34  ;;  %v362_v51 = vrot.slane %v360_v42, 4  ;;  %v368_v53 = vrot.slane %v366_v43, 5  ;;  %v445_v56 = vrot.slane %v443_v47, 4  ;;  %v452_v60 = vshll.u32 %v4250_v44, 16 }
  0x34   : > { %v431_v55 = vsel %vm4182_vm4, %v426_v45, %v430_v22  ;;  %v448_v59 = vrot.slane %v446_v48, 5  ;;  %3761 = vmatprep.subr.msk.bf16.mxu0 %vm541_vm0, %v4245_v38  ;;  %v441_v34 = vsel %vm4182_vm4, %v436_v49, %v440_v27  ;;  %v354_v0 = vrot.slane %v353_v50, 4  ;;  %v806_v50 = vld [vmem:[%s4141_s6] sm:$0xe] }
  0x35   : > { %v363_v1 = vor.u32 %v362_v51, %v358_v46  ;;  %v456_v2 = vshrl.u32 %v4250_v44, 16  ;;  %v3135_v9 = vcombine.low %v431_v55, %v441_v34  ;;  %v454_v12 = vrot.slane %v452_v60, 5 }
  0x36   : > { %v449_v10 = vor.u32 %v448_v59, %v445_v56  ;;  %v462_v16 = vshll.u32 %v4257_v54, 16  ;;  %v359_v18 = vsel %vm4182_vm4, %v354_v0, %v358_v46  ;;  %v371_v22 = vshrl.u32 %v4263_v63, 16  ;;  %v4301_v46 = vld [vmem:[%s4141_s6 + $0x5c] sm:$0x1] }
  0x37   : > { %v364_v20 = vrot.slane %v363_v1, 4  ;;  %v458_v21 = vrot.slane %v456_v2, 4  ;;  %3603 = vmatmul.mubr.msk.bf16.vlgmr.msra.gmra.mxu1 %vm516_vm3, %v3135_v9  ;;  %v374_v27 = vshll.u32 %v4263_v63, 16  ;;  %v380_v31 = vshll.u32 %v4271_v7, 16 }
  0x38   : > { %v450_v25 = vrot.slane %v449_v10, 4  ;;  %v464_v26 = vrot.slane %v462_v16, 5  ;;  %3611 = vmatpush3.bf16.msra.mxu1 %v4167_v15  ;;  %v373_v37 = vrot.slane %v371_v22, 4  ;;  %v384_v39 = vshrl.u32 %v4271_v7, 16 }
  0x39   : > { %v369_v35 = vsel %vm4182_vm4, %v364_v20, %v368_v53  ;;  %v459_v36 = vor.u32 %v458_v21, %v454_v12  ;;  %v376_v43 = vrot.slane %v374_v27, 5  ;;  %v382_v45 = vrot.slane %v380_v31, 5  ;;  %3760 = vmatprep.subr.msk.bf16.mxu1 %vm541_vm0, %v4276_v8 }
  0x3a   : > { %v3132_v41 = vcombine.low %v359_v18, %v369_v35  ;;  %v455_v42 = vsel %vm4182_vm4, %v450_v25, %v454_v12  ;;  %v386_v15 = vrot.slane %v384_v39, 4  ;;  %v390_v48 = vshll.u32 %v4280_v17, 16  ;;  %v807_v12 = vld [vmem:[%s4141_s6 + $0xc] sm:$0xe] }
  0x3b   : > { %v460_v47 = vrot.slane %v459_v36, 4  ;;  %v467_v49 = vshrl.u32 %v4286_v24, 16  ;;  %v377_v51 = vor.u32 %v376_v43, %v373_v37  ;;  %v470_v53 = vshll.u32 %v4286_v24, 16 }
  0x3c   : > { %3598 = vmatprep.mubr.msk.bf16.mxu0 %vm516_vm3, %v3132_v41  ;;  %v476_v55 = vshll.u32 %v4292_v33, 16  ;;  %v480_v56 = vshrl.u32 %v4292_v33, 16  ;;  %v387_v60 = vor.u32 %v386_v15, %v382_v45  ;;  %v392_v34 = vrot.slane %v390_v48, 5  ;;  %v808_v41 = vld [vmem:[%s4141_s6 + $0x18] sm:$0xe] }
  0x3d   : > { %v465_v59 = vsel %vm4182_vm4, %v460_v47, %v464_v26  ;;  %v469_v0 = vrot.slane %v467_v49, 4  ;;  %v378_v2 = vrot.slane %v377_v51, 4  ;;  %v472_v9 = vrot.slane %v470_v53, 5 }
  0x3e   : > { %v3136_v1 = vcombine.low %v455_v42, %v465_v59  ;;  %v478_v10 = vrot.slane %v476_v55, 5  ;;  %v388_v16 = vrot.slane %v387_v60, 4  ;;  %v482_v18 = vrot.slane %v480_v56, 4  ;;  %v810_v55 = vld [vmem:[%s4141_s6 + $0x30] sm:$0xe] }
  0x3f   : > { %v486_v20 = vshll.u32 %v4301_v46, 16  ;;  %v3162_v22 = vrot.slane %v806_v50, 9  ;;  %v845_v25 = vrot.slane %v4190_v40, 5  ;;  %v383_v26 = vsel %vm4182_vm4, %v378_v2, %v382_v45 }
  0x40   : > { %3606 = vmatprep.mubr.msk.bf16.mxu1 %vm516_vm3, %v3136_v1  ;;  %v473_v27 = vor.u32 %v472_v9, %v469_v0  ;;  %v835_v31 = vrot.slane %v4147_v5, 5  ;;  %v393_v35 = vsel %vm4182_vm4, %v388_v16, %v392_v34  ;;  %v483_v36 = vor.u32 %v482_v18, %v478_v10  ;;  %v3314_v1 = vld [vmem:[%s5377_s1 + $0xc] sm:$0x3] }
  0x41   : > { %v488_v37 = vrot.slane %v486_v20, 5  ;;  %v3163_v39 = vrot.slane %v807_v12, 9  ;;  %v3133_v42 = vcombine.low %v383_v26, %v393_v35  ;;  %v3146_v45 = vcombine.low %v4144_v4, %v4147_v5  ;;  %v809_v5 = vld [vmem:[%s4141_s6 + $0x24] sm:$0xe]  ;;  %v811_v12 = vld [vmem:[%s4141_s6 + $0x3c] sm:$0xe] }
  0x42   : > { %v474_v43 = vrot.slane %v473_v27, 4  ;;  %v836_v40 = vsel %vm4318_vm7, %v3162_v22, %v835_v31  ;;  %v837_v47 = vrot.slane %v835_v31, 4  ;;  %v484_v15 = vrot.slane %v483_v36, 4 }
  0x43   : > { %v843_v48 = vsel %vm4318_vm7, %v3163_v39, %v842_v61  ;;  %v844_v49 = vrot.slane %v842_v61, 4  ;;  %3599 = vmatmul.mubr.msk.bf16.gmra.mxu0 %vm516_vm3, %v3133_v42  ;;  %v3164_v53 = vrot.slane %v808_v41, 9  ;;  %v849_v4 = vrot.slane %v4226_v19, 5  ;;  %v812_v41 = vld [vmem:[%s4141_s6 + $0x48] sm:$0xe] }
  0x44   : > { %v479_v50 = vsel %vm4182_vm4, %v474_v43, %v478_v10  ;;  %v839_v51 = vsel %vm4318_vm7, %v837_v47, %v838_v58  ;;  %v489_v56 = vsel %vm4182_vm4, %v484_v15, %v488_v37  ;;  %v852_v60 = vrot.slane %v4232_v23, 5  ;;  %v4396_v42 = vld [vmem:[%s4141_s6 + $0x54] sm:$0xe]  ;;  %v3222_v43 = vld [vmem:[%s4141_s6 + $0xc] sm:$0xf] }
  0x45   : > { %v3171_v61 = vcombine.low %v836_v40, %v839_v51  ;;  %v846_v59 = vsel %vm4318_vm7, %v844_v49, %v845_v25  ;;  %v3137_v34 = vcombine.low %v479_v50, %v489_v56  ;;  %v1142_v6 = vsel %vm541_vm0, %v4276_v8, 0  ;;  %v4416_v49 = vld [vmem:[%s5377_s1 + $0xa] sm:$0x3] }
  0x46   : > { %v850_v58 = vsel %vm4318_vm7, %v3164_v53, %v849_v4  ;;  %v851_v0 = vrot.slane %v849_v4, 4  ;;  %v866_v2 = vrot.slane %v4164_v14, 5  ;;  %v3165_v9 = vrot.slane %v809_v5, 9  ;;  %v3225_v5 = vld [vmem:[%s4141_s6 + $0x18] sm:$0xf] }
  0x47   : > { %3630 = vmatprep.mubr.msk.bf16.mxu0 %vm516_vm3, %v3171_v61  ;;  %v856_v10 = vrot.slane %v4271_v7, 5  ;;  %v859_v23 = vrot.slane %v4280_v17, 5  ;;  %3607 = vmatmul.mubr.msk.bf16.gmra.mxu1 %vm516_vm3, %v3137_v34  ;;  %v3172_v8 = vcombine.low %v843_v48, %v846_v59  ;;  %v3166_v18 = vrot.slane %v810_v55, 9  ;;  %v4411_v48 = vld [vmem:[%s4141_s6 + $0x14] sm:$0x1] }
  0x48   : > { %v853_v16 = vsel %vm4318_vm7, %v851_v0, %v852_v60  ;;  %v863_v20 = vrot.slane %v4161_v13, 5  ;;  %3612 = vmatprep.mubr.msk.bf16.mxu1 %vm516_vm3, %v3146_v45  ;;  %v1524_v14 = vsel %vm541_vm0, %v4245_v38, 0  ;;  %v4375_v17 = vsel %vm541_vm0, %v3314_v1, 0  ;;  %v4427_v60 = vld [vmem:[%s4141_s6 + $0x1c] sm:$0xf] }
  0x49   : > { %v3173_v22 = vcombine.low %v850_v58, %v853_v16  ;;  %v858_v25 = vrot.slane %v856_v10, 4  ;;  %v3147_v26 = vcombine.low %v4175_v28, %v4178_v29  ;;  %v3167_v31 = vrot.slane %v811_v12, 9 }
  0x4a   : > { %v865_v27 = vrot.slane %v863_v20, 4  ;;  %v870_v35 = vrot.slane %v4205_v57, 5  ;;  %v3148_v36 = vcombine.low %v4219_v3, %v4226_v19  ;;  %v857_v38 = vsel %vm4318_vm7, %v3165_v9, %v856_v10 }
  0x4b   : > { %v860_v37 = vsel %vm4318_vm7, %v858_v25, %v859_v23  ;;  %v864_v39 = vsel %vm4318_vm7, %v3166_v18, %v863_v20  ;;  %3631 = vmatmul.mubr.msk.bf16.vlgmr.msra.gmra.mxu0 %vm516_vm3, %v3172_v8  ;;  %v3149_v28 = vcombine.low %v4263_v63, %v4271_v7  ;;  %v873_v19 = vrot.slane %v4213_v62, 5  ;;  %v4408_v62 = vld [vmem:[%s4141_s6 + $0x10] sm:$0xf] }
  0x4c   : > { %v867_v29 = vsel %vm4318_vm7, %v865_v27, %v866_v2  ;;  %v872_v3 = vrot.slane %v870_v35, 4  ;;  %3665 = vmatpush3.bf16.msra.mxu0 %v1524_v14  ;;  %3634 = vmatprep.mubr.msk.bf16.mxu0 %vm516_vm3, %v3173_v22  ;;  %v3150_v40 = vcombine.low %v4157_v11, %v4161_v13  ;;  %v3151_v47 = vcombine.low %v4201_v52, %v4205_v57  ;;  %v3228_v2 = vld [vmem:[%s4141_s6 + $0x24] sm:$0xf]  ;;  %v4450_v22 = vld [vmem:[%s4141_s6 + $0x20] sm:$0x1] }
  0x4d   : > { %v3152_v15 = vcombine.low %v4239_v32, %v4250_v44  ;;  %v877_v45 = vrot.slane %v4250_v44, 5  ;;  %v3174_v50 = vcombine.low %v857_v38, %v860_v37  ;;  %v3175_v51 = vcombine.low %v864_v39, %v867_v29  ;;  %3763 = vmatprep.subr.msk.bf16.mxu0 %vm541_vm0, %v3314_v1  ;;  %v3234_v13 = vld [vmem:[%s4141_s6 + $0x3c] sm:$0xf]  ;;  %v4523_v57 = vld [vmem:[%s4141_s6 + $0x4c] sm:$0xf] }
  0x4e   : > { %v4420_v53 = vsel %vm4318_vm7, %v3167_v31, %v870_v35  ;;  %v3168_v4 = vrot.slane %v812_v41, 9  ;;  %v880_v56 = vrot.slane %v4257_v54, 5  ;;  %v884_v61 = vrot.slane %v4292_v33, 5  ;;  %v4456_v35 = vld [vmem:[%s4141_s6 + $0x28] sm:$0xf] }
  0x4f   : > { %v879_v55 = vrot.slane %v877_v45, 4  ;;  %v1282_v59 = vshrl.u32 %v3222_v43, 16  ;;  %3613 = vmatmul.mubr.msk.bf16.vlgmr.msra.gmra.mxu1 %vm516_vm3, %v3147_v26  ;;  %v4432_v34 = vsel %vm4318_vm7, %v872_v3, %v873_v19  ;;  %v3153_v58 = vcombine.low %v4286_v24, %v4292_v33 }
  0x50   : > { %v1285_v0 = vshll.u32 %v3222_v43, 16  ;;  %v1291_v1 = vshll.u32 %v4408_v62, 16  ;;  %3647 = vmatpush3.bf16.msra.mxu1 %v1142_v6  ;;  %3616 = vmatprep.mubr.msk.bf16.mxu1 %vm516_vm3, %v3148_v36  ;;  %v3169_v54 = vrot.slane %v4396_v42, 9  ;;  %v1295_v10 = vshrl.u32 %v4408_v62, 16  ;;  %v4462_v42 = vld [vmem:[%s4141_s6 + $0x2c] sm:$0x1] }
  0x51   : > { %v1284_v9 = vrot.slane %v1282_v59, 4  ;;  %v1301_v23 = vshll.u32 %v4411_v48, 16  ;;  %v878_v12 = vsel %vm4318_vm7, %v3168_v4, %v877_v45  ;;  %v887_v8 = vrot.slane %v4301_v46, 5  ;;  %3762 = vmatprep.subr.msk.bf16.mxu1 %vm541_vm0, %v4416_v49 }
  0x52   : > { %v1287_v16 = vrot.slane %v1285_v0, 5  ;;  %v1293_v18 = vrot.slane %v1291_v1, 5  ;;  %v881_v6 = vsel %vm4318_vm7, %v879_v55, %v880_v56  ;;  %v886_v20 = vrot.slane %v884_v61, 4 }
  0x53   : > { %v1297_v14 = vrot.slane %v1295_v10, 4  ;;  %v1306_v25 = vshrl.u32 %v3225_v5, 16  ;;  %3635 = vmatmul.mubr.msk.bf16.gmra.mxu0 %vm516_vm3, %v3174_v50  ;;  %v1309_v27 = vshll.u32 %v3225_v5, 16  ;;  %v1315_v46 = vshll.u32 %v4427_v60, 16  ;;  %v3231_v5 = vld [vmem:[%s4141_s6 + $0x30] sm:$0xf] }
  0x54   : > { %v1288_v26 = vor.u32 %v1287_v16, %v1284_v9  ;;  %v1319_v31 = vshrl.u32 %v4427_v60, 16  ;;  %3638 = vmatprep.mubr.msk.bf16.mxu0 %vm516_vm3, %v3175_v51  ;;  %v1303_v38 = vrot.slane %v1301_v23, 5  ;;  %v1330_v39 = vshrl.u32 %v3228_v2, 16  ;;  %v4495_v9 = vld [vmem:[%s4141_s6 + $0x38] sm:$0x1] }
  0x55   : > { %v1298_v36 = vor.u32 %v1297_v14, %v1293_v18  ;;  %v1308_v37 = vrot.slane %v1306_v25, 4  ;;  %v1311_v29 = vrot.slane %v1309_v27, 5  ;;  %v4459_v3 = vrot.slane %v1315_v46, 5  ;;  %v4502_v25 = vld [vmem:[%s4141_s6 + $0x40] sm:$0xf] }
  0x56   : > { %v1289_v41 = vrot.slane %v1288_v26, 4  ;;  %v1321_v19 = vrot.slane %v1319_v31, 4  ;;  %v3176_v43 = vcombine.low %v4420_v53, %v4432_v34  ;;  %v1332_v50 = vrot.slane %v1330_v39, 4  ;;  %v4483_v34 = vld [vmem:[%s4141_s6 + $0x34] sm:$0xf] }
  0x57   : > { %v1299_v45 = vrot.slane %v1298_v36, 4  ;;  %v1333_v4 = vshll.u32 %v3228_v2, 16  ;;  %3617 = vmatmul.mubr.msk.bf16.gmra.mxu1 %vm516_vm3, %v3149_v28  ;;  %v3177_v51 = vcombine.low %v878_v12, %v881_v6  ;;  %v885_v55 = vsel %vm4318_vm7, %v3169_v54, %v884_v61  ;;  %v4508_v36 = vld [vmem:[%s4141_s6 + $0x44] sm:$0x1] }
  0x58   : > { %v1325_v56 = vshll.u32 %v4450_v22, 16  ;;  %v1339_v59 = vshll.u32 %v4456_v35, 16  ;;  %3620 = vmatprep.mubr.msk.bf16.mxu1 %vm516_vm3, %v3150_v40  ;;  %v888_v63 = vsel %vm4318_vm7, %v886_v20, %v887_v8  ;;  %v1312_v7 = vor.u32 %v1311_v29, %v1308_v37 }
  0x59   : > { %v1335_v53 = vrot.slane %v1333_v4, 5  ;;  %v1343_v28 = vshrl.u32 %v4456_v35, 16  ;;  %v1294_v61 = vsel %vm4182_vm4, %v1289_v41, %v1293_v18  ;;  %v1304_v0 = vsel %vm4182_vm4, %v1299_v45, %v1303_v38 }
  0x5a   : > { %v1322_v1 = vor.u32 %v1321_v19, %v4459_v3  ;;  %v4490_v11 = vrot.slane %v1339_v59, 5  ;;  %v1349_v54 = vshll.u32 %v4462_v42, 16  ;;  %v1354_v10 = vshrl.u32 %v3231_v5, 16 }
  0x5b   : > { %v1336_v40 = vor.u32 %v1335_v53, %v1332_v50  ;;  %v1345_v2 = vrot.slane %v1343_v28, 4  ;;  %3639 = vmatmul.mubr.msk.bf16.gmra.mxu0 %vm516_vm3, %v3176_v43  ;;  %v3178_v23 = vcombine.low %v885_v55, %v888_v63  ;;  %v1327_v12 = vrot.slane %v1325_v56, 5  ;;  %v3237_v50 = vld [vmem:[%s4141_s6 + $0x48] sm:$0xf] }
  0x5c   : > { %v1357_v8 = vshll.u32 %v3231_v5, 16  ;;  %v1363_v16 = vshll.u32 %v4483_v34, 16  ;;  %3642 = vmatprep.mubr.msk.bf16.mxu0 %vm516_vm3, %v3177_v51  ;;  %v3247_v18 = vcombine.low %v1294_v61, %v1304_v0  ;;  %v1313_v6 = vrot.slane %v1312_v7, 4  ;;  %v3848_v61 = vld [vmem:[%s4141_s6 + $0xc] sm:$0xff]  }
  0x5d   : > { %v1346_v20 = vor.u32 %v1345_v2, %v4490_v11  ;;  %v1356_v14 = vrot.slane %v1354_v10, 4  ;;  %v1323_v26 = vrot.slane %v1322_v1, 4  ;;  %v1367_v31 = vshrl.u32 %v4483_v34, 16  ;;  %v3240_v2 = vld [vmem:[%s4141_s6 + $0x54] sm:$0xf] }
  0x5e   : > { %v1359_v27 = vrot.slane %v1357_v8, 5  ;;  %v4504_v46 = vrot.slane %v1363_v16, 5  ;;  %v1337_v38 = vrot.slane %v1336_v40, 4  ;;  %v1351_v37 = vrot.slane %v1349_v54, 5 }
  0x5f   : > { %v1378_v39 = vshrl.u32 %v3234_v13, 16  ;;  %v1381_v41 = vshll.u32 %v3234_v13, 16  ;;  %3621 = vmatmul.mubr.msk.bf16.gmra.mxu1 %vm516_vm3, %v3151_v47  ;;  %v1347_v29 = vrot.slane %v1346_v20, 4  ;;  %v1369_v19 = vrot.slane %v1367_v31, 4 }
  0x60   : > { %v1373_v43 = vshll.u32 %v4495_v9, 16  ;;  %v1387_v45 = vshll.u32 %v4502_v25, 16  ;;  %3624 = vmatprep.mubr.msk.bf16.mxu1 %vm516_vm3, %v3152_v15  ;;  %v1360_v4 = vor.u32 %v1359_v27, %v1356_v14  ;;  %v1391_v52 = vshrl.u32 %v4502_v25, 16 }
  0x61   : > { %v1380_v5 = vrot.slane %v1378_v39, 4  ;;  %v1383_v51 = vrot.slane %v1381_v41, 5  ;;  %v1318_v47 = vsel %vm4182_vm4, %v1313_v6, %v4459_v3  ;;  %v1328_v55 = vsel %vm4182_vm4, %v1323_v26, %v1327_v12  ;;  %v4547_v12 = vld [vmem:[%s4141_s6 + $0x58] sm:$0xf]  ;;  %v4565_v39 = vld [vmem:[%s4141_s6 + $0x5c] sm:$0x1] }
  0x62   : > { %v1370_v56 = vor.u32 %v1369_v19, %v4504_v46  ;;  %v4531_v32 = vrot.slane %v1387_v45, 5  ;;  %v1393_v15 = vrot.slane %v1391_v52, 4  ;;  %v1397_v59 = vshll.u32 %v4508_v36, 16  ;;  %v3849_v52 = vld [vmem:[%s4141_s6 + $0x18] sm:$0xff]  }
  0x63   : > { %v1384_v44 = vor.u32 %v1383_v51, %v1380_v5  ;;  %v1402_v63 = vshrl.u32 %v3237_v50, 16  ;;  %3643 = vmatmul.mubr.msk.bf16.gmra.mxu0 %vm516_vm3, %v3178_v23  ;;  %v1342_v3 = vsel %vm4182_vm4, %v1337_v38, %v4490_v11  ;;  %v1352_v7 = vsel %vm4182_vm4, %v1347_v29, %v1351_v37  ;;  %v4582_v51 = vld [vmem:[%s5377_s1 + $0x10] sm:$0x3] }
  0x64   : > { %v1405_v53 = vshll.u32 %v3237_v50, 16  ;;  %v1411_v28 = vshll.u32 %v4523_v57, 16  ;;  %3666 = vmatprep.mubr.msk.bf16.mxu0 %vm516_vm3, %v3247_v18  ;;  %v1361_v0 = vrot.slane %v1360_v4, 4  ;;  %v1371_v1 = vrot.slane %v1370_v56, 4  ;;  %v4550_v18 = vld [vmem:[%s4141_s6 + $0x50] sm:$0x1] }
  0x65   : > { %v1375_v13 = vrot.slane %v1373_v43, 5  ;;  %v1394_v40 = vor.u32 %v1393_v15, %v4531_v32  ;;  %v1385_v54 = vrot.slane %v1384_v44, 4  ;;  %v1404_v10 = vrot.slane %v1402_v63, 4  ;;  %v4575_v43 = vld [vmem:[%s4141_s6 + $0x64] sm:$0xf] }
  0x66   : > { %v1407_v23 = vrot.slane %v1405_v53, 5  ;;  %v1415_v11 = vshrl.u32 %v4523_v57, 16  ;;  %v3248_v8 = vcombine.low %v1318_v47, %v1328_v55  ;;  %v3249_v16 = vcombine.low %v1342_v3, %v1352_v7  ;;  %v3850_v44 = vld [vmem:[%s4141_s6 + $0x24] sm:$0xff]  }
  0x67   : > { %v1395_v6 = vrot.slane %v1394_v40, 4  ;;  %v1399_v20 = vrot.slane %v1397_v59, 5  ;;  %3625 = vmatmul.mubr.msk.bf16.gmra.mxu1 %vm516_vm3, %v3153_v58  ;;  %v4556_v14 = vrot.slane %v1411_v28, 5  ;;  %v1426_v27 = vshrl.u32 %v3240_v2, 16  ;;  %v3243_v58 = vld [vmem:[%s4141_s6 + $0x60] sm:$0xf] }
  0x68   : > { %v1417_v26 = vrot.slane %v1415_v11, 4  ;;  %v1429_v31 = vshll.u32 %v3240_v2, 16  ;;  %3648 = vmatprep.mubr.msk.bf16.mxu1 %vm516_vm3, %v3848_v61  ;;  %v1366_v38 = vsel %vm4182_vm4, %v1361_v0, %v4504_v46  ;;  %v1376_v37 = vsel %vm4182_vm4, %v1371_v1, %v1375_v13  ;;  %v3355_v0 = vld [vmem:[%s5377_s1 + $0xe] sm:$0x3]  ;;  %v4603_v11 = vld [vmem:[%s4141_s6 + $0x68] sm:$0x1] }
  0x69   : > { %v1435_v24 = vshll.u32 %v4547_v12, 16  ;;  %v1439_v33 = vshrl.u32 %v4547_v12, 16  ;;  %v1390_v41 = vsel %vm4182_vm4, %v1385_v54, %v4531_v32  ;;  %v1408_v29 = vor.u32 %v1407_v23, %v1404_v10 }
  0x6a   : > { %v1421_v19 = vshll.u32 %v4550_v18, 16  ;;  %v1428_v46 = vrot.slane %v1426_v27, 4  ;;  %v1400_v45 = vsel %vm4182_vm4, %v1395_v6, %v1399_v20  ;;  %v1431_v50 = vrot.slane %v1429_v31, 5 }
  0x6b   : > { %v1437_v4 = vrot.slane %v1435_v24, 5  ;;  %v1441_v5 = vrot.slane %v1439_v33, 4  ;;  %3667 = vmatmul.mubr.msk.bf16.vlgmr.msra.gmra.mxu0 %vm516_vm3, %v3248_v8  ;;  %v1418_v47 = vor.u32 %v1417_v26, %v4556_v14  ;;  %v1445_v55 = vshll.u32 %v4565_v39, 16  ;;  %v3851_v8 = vld [vmem:[%s4141_s6 + $0x30] sm:$0xff]   ;;  %v3852_v26 = vld [vmem:[%s4141_s6 + $0x3c] sm:$0xff]  }
  0x6c   : > { %v1450_v56 = vshrl.u32 %v3243_v58, 16  ;;  %v1453_v32 = vshll.u32 %v3243_v58, 16  ;;  %3701 = vmatpush3.bf16.msra.mxu0 %v4375_v17  ;;  %3670 = vmatprep.mubr.msk.bf16.mxu0 %vm516_vm3, %v3249_v16  ;;  %v1432_v15 = vor.u32 %v1431_v50, %v1428_v46  ;;  %v1459_v63 = vshll.u32 %v4575_v43, 16  ;;  %v3263_v33 = vld [vmem:[%s4141_s6 + $0xc] sm:$0xe] }
  0x6d   : > { %v1442_v59 = vor.u32 %v1441_v5, %v1437_v4  ;;  %v1778_v3 = vsel %vm541_vm0, %v4416_v49, 0  ;;  %v1463_v7 = vshrl.u32 %v4575_v43, 16  ;;  %3765 = vmatprep.subr.msk.bf16.mxu0 %vm541_vm0, %v4582_v51  ;;  %v3250_v53 = vcombine.low %v1366_v38, %v1376_v37  ;;  %v3264_v46 = vld [vmem:[%s4141_s6 + $0x18] sm:$0xe]  ;;  %v3853_v5 = vld [vmem:[%s4141_s6 + $0x48] sm:$0xff]  }
  0x6e   : > { %v3251_v28 = vcombine.low %v1390_v41, %v1400_v45  ;;  %v1409_v61 = vrot.slane %v1408_v29, 4  ;;  %v1423_v17 = vrot.slane %v1421_v19, 5  ;;  %v1419_v1 = vrot.slane %v1418_v47, 4 }
  0x6f   : > { %3649 = vmatmul.mubr.msk.bf16.vlgmr.msra.gmra.mxu1 %vm516_vm3, %v3849_v52  ;;  %v1447_v13 = vrot.slane %v1445_v55, 5  ;;  %v1452_v49 = vrot.slane %v1450_v56, 4  ;;  %v1455_v40 = vrot.slane %v1453_v32, 5  ;;  %v1433_v2 = vrot.slane %v1432_v15, 4  ;;  %v3854_v56 = vld [vmem:[%s4141_s6 + $0x54] sm:$0xff]  }
  0x70   : > { %3683 = vmatpush3.bf16.msra.mxu1 %v1778_v3  ;;  %3652 = vmatprep.mubr.msk.bf16.mxu1 %vm516_vm3, %v3850_v44  ;;  %v1443_v54 = vrot.slane %v1442_v59, 4  ;;  %v1461_v10 = vrot.slane %v1459_v63, 5  ;;  %v1465_v23 = vrot.slane %v1463_v7, 4  ;;  %v1414_v16 = vsel %vm4182_vm4, %v1409_v61, %v4556_v14  ;;  %v3266_v63 = vld [vmem:[%s4141_s6 + $0x30] sm:$0xe] }
  0x71   : > { %3764 = vmatprep.subr.msk.bf16.mxu1 %vm541_vm0, %v3355_v0  ;;  %v1424_v6 = vsel %vm4182_vm4, %v1419_v1, %v1423_v17  ;;  %v1456_v20 = vor.u32 %v1455_v40, %v1452_v49  ;;  %v1438_v27 = vsel %vm4182_vm4, %v1433_v2, %v1437_v4  ;;  %v1469_v37 = vshll.u32 %v4603_v11, 16  ;;  %v3265_v4 = vld [vmem:[%s4141_s6 + $0x24] sm:$0xe]  ;;  %v3267_v7 = vld [vmem:[%s4141_s6 + $0x3c] sm:$0xe] }
  0x72   : > { %v1448_v31 = vsel %vm4182_vm4, %v1443_v54, %v1447_v13  ;;  %v1466_v38 = vor.u32 %v1465_v23, %v1461_v10  ;;  %v3252_v14 = vcombine.low %v1414_v16, %v1424_v6  ;;  %v1673_v58 = vrot.slane %v4408_v62, 5  ;;  %v3268_v13 = vld [vmem:[%s4141_s6 + $0x48] sm:$0xe]  ;;  %v3331_v49 = vld [vmem:[%s4141_s6 + $0x18] sm:$0xf]  ;;  %v3855_v6 = vld [vmem:[%s4141_s6 + $0x60] sm:$0xff]  }
  0x73   : > { %3671 = vmatmul.mubr.msk.bf16.gmra.mxu0 %vm516_vm3, %v3250_v53  ;;  %v3253_v24 = vcombine.low %v1438_v27, %v1448_v31  ;;  %v1457_v41 = vrot.slane %v1456_v20, 4  ;;  %v1471_v19 = vrot.slane %v1469_v37, 5  ;;  %v1680_v45 = vrot.slane %v4427_v60, 5 }
  0x74   : > { %3674 = vmatprep.mubr.msk.bf16.mxu0 %vm516_vm3, %v3251_v28  ;;  %v1467_v29 = vrot.slane %v1466_v38, 4  ;;  %v1687_v50 = vrot.slane %v4456_v35, 5  ;;  %v3271_v52 = vrot.slane %v3263_v33, 9  ;;  %v1675_v47 = vrot.slane %v1673_v58, 4 }
  0x75   : > { %v1676_v62 = vrot.slane %v4411_v48, 5  ;;  %v3272_v55 = vrot.slane %v3264_v46, 9  ;;  %v1462_v32 = vsel %vm4182_vm4, %v1457_v41, %v1461_v10  ;;  %v1682_v35 = vrot.slane %v1680_v45, 4  ;;  %v4673_v10 = vld [vmem:[%s4141_s6 + $0x1c] sm:$0xf] }
  0x76   : > { %v1472_v60 = vsel %vm4182_vm4, %v1467_v29, %v1471_v19  ;;  %v1683_v44 = vrot.slane %v4450_v22, 5  ;;  %v3273_v15 = vrot.slane %v3265_v4, 9  ;;  %v1689_v59 = vrot.slane %v1687_v50, 4  ;;  %v3334_v29 = vld [vmem:[%s4141_s6 + $0x24] sm:$0xf]  ;;  %v3858_v4 = vld [vmem:[%s4141_s6 + $0x30] sm:$0xff]  }
  0x77   : > { %3653 = vmatmul.mubr.msk.bf16.gmra.mxu1 %vm516_vm3, %v3851_v8  ;;  %v1690_v48 = vrot.slane %v4462_v42, 5  ;;  %v1694_v3 = vrot.slane %v4483_v34, 5  ;;  %v3254_v53 = vcombine.low %v1462_v32, %v1472_v60  ;;  %v1674_v28 = vsel %vm4318_vm7, %v3271_v52, %v1673_v58  ;;  %v3856_v42 = vld [vmem:[%s4141_s6 + $0x18] sm:$0xff]  }
  0x78   : > { %3656 = vmatprep.mubr.msk.bf16.mxu1 %vm516_vm3, %v3852_v26  ;;  %v1677_v22 = vsel %vm4318_vm7, %v1675_v47, %v1676_v62  ;;  %v4648_v61 = vsel %vm541_vm0, %v3355_v0, 0  ;;  %v4654_v34 = vsel %vm4318_vm7, %v3272_v55, %v1680_v45  ;;  %v4658_v17 = vsel %vm4318_vm7, %v1682_v35, %v1683_v44  ;;  %v4717_v55 = vld [vmem:[%s4141_s6 + $0x28] sm:$0xf] }
  0x79   : > { %v2616_v1 = vsel %vm541_vm0, %v4582_v51, 0  ;;  %v4666_v0 = vsel %vm4318_vm7, %v3273_v15, %v1687_v50  ;;  %v4670_v40 = vsel %vm4318_vm7, %v1689_v59, %v1690_v48  ;;  %v3274_v2 = vrot.slane %v3266_v63, 9  ;;  %v3333_v15 = vld [vmem:[%s4141_s6 + $0x20] sm:$0x1] }
  0x7a   : > { %v3275_v54 = vrot.slane %v3267_v7, 9  ;;  %v3280_v23 = vcombine.low %v1674_v28, %v1677_v22  ;;  %v1696_v8 = vrot.slane %v1694_v3, 4  ;;  %v1697_v16 = vrot.slane %v4495_v9, 5 }
  0x7b   : > { %3675 = vmatmul.mubr.msk.bf16.gmra.mxu0 %vm516_vm3, %v3252_v14  ;;  %v1701_v51 = vrot.slane %v4502_v25, 5  ;;  %v3281_v20 = vcombine.low %v4654_v34, %v4658_v17  ;;  %v3276_v26 = vrot.slane %v3268_v13, 9  ;;  %v2120_v27 = vshrl.u32 %v3331_v49, 16  ;;  %v3269_v25 = vld [vmem:[%s4141_s6 + $0x54] sm:$0xe] }
  0x7c   : > { %3678 = vmatprep.mubr.msk.bf16.mxu0 %vm516_vm3, %v3253_v24  ;;  %v2123_v31 = vshll.u32 %v3331_v49, 16  ;;  %v3282_v38 = vcombine.low %v4666_v0, %v4670_v40  ;;  %v1704_v9 = vrot.slane %v4508_v36, 5  ;;  %v2129_v37 = vshll.u32 %v4673_v10, 16  ;;  %v3857_v36 = vld [vmem:[%s4141_s6 + $0x24] sm:$0xff]  }
  0x7d   : > { %v2133_v14 = vshrl.u32 %v4673_v10, 16  ;;  %v4690_v24 = vsel %vm4318_vm7, %v3274_v2, %v1694_v3  ;;  %v4694_v33 = vsel %vm4318_vm7, %v3275_v54, %v1701_v51  ;;  %v1708_v58 = vrot.slane %v4523_v57, 5  ;;  %v3373_v17 = vld [vmem:[%s4141_s6 + $0x24] sm:$0xe] }
  0x7e   : > { %v1715_v41 = vrot.slane %v4547_v12, 5  ;;  %v4702_v19 = vsel %vm4318_vm7, %v1696_v8, %v1697_v16  ;;  %v1703_v46 = vrot.slane %v1701_v51, 4  ;;  %v1711_v45 = vrot.slane %v4550_v18, 5 }
  0x7f   : > { %3657 = vmatmul.mubr.msk.bf16.gmra.mxu1 %vm516_vm3, %v3853_v5  ;;  %v1722_v50 = vrot.slane %v4575_v43, 5  ;;  %v4710_v57 = vsel %vm4318_vm7, %v3276_v26, %v1708_v58  ;;  %v3277_v12 = vrot.slane %v3269_v25, 9  ;;  %v3270_v5 = vld [vmem:[%s4141_s6 + $0x60] sm:$0xe]  ;;  %v2122_v52 = vrot.slane %v2120_v27, 4 }
  0x80   : > { %3660 = vmatprep.mubr.msk.bf16.mxu1 %vm516_vm3, %v3854_v56  ;;  %v2125_v47 = vrot.slane %v2123_v31, 5  ;;  %v4714_v62 = vrot.slane %v2129_v37, 5  ;;  %v2135_v18 = vrot.slane %v2133_v14, 4  ;;  %v2144_v43 = vshrl.u32 %v3334_v29, 16  ;;  %v3337_v26 = vld [vmem:[%s4141_s6 + $0x30] sm:$0xf] }
  0x81   : > { %v2147_v56 = vshll.u32 %v3334_v29, 16  ;;  %v3283_v32 = vcombine.low %v4690_v24, %v4702_v19  ;;  %v1710_v60 = vrot.slane %v1708_v58, 4  ;;  %v1717_v35 = vrot.slane %v1715_v41, 4  ;;  %v4762_v27 = vld [vmem:[%s4141_s6 + $0x34] sm:$0xf]  ;;  %v3859_v31 = vld [vmem:[%s4141_s6 + $0x3c] sm:$0xff]  }
  0x82   : > { %v1718_v44 = vrot.slane %v4565_v39, 5  ;;  %v4725_v59 = vsel %vm4318_vm7, %v1703_v46, %v1704_v9  ;;  %v3278_v48 = vrot.slane %v3270_v5, 9  ;;  %v1724_v63 = vrot.slane %v1722_v50, 4 }
  0x83   : > { %3679 = vmatmul.mubr.msk.bf16.gmra.mxu0 %vm516_vm3, %v3254_v53  ;;  %v1725_v3 = vrot.slane %v4603_v11, 5  ;;  %v2126_v7 = vor.u32 %v2125_v47, %v2122_v52  ;;  %v3372_v53 = vld [vmem:[%s4141_s6 + $0x18] sm:$0xe]  ;;  %v2511_v28 = vrot.slane %v4673_v10, 5  ;;  %v2153_v22 = vshll.u32 %v4717_v55, 16 }
  0x84   : > { %3702 = vmatprep.mubr.msk.bf16.mxu0 %vm516_vm3, %v3856_v42  ;;  %v2157_v39 = vshrl.u32 %v4717_v55, 16  ;;  %v2136_v42 = vor.u32 %v2135_v18, %v4714_v62  ;;  %v2139_v11 = vshll.u32 %v3333_v15, 16  ;;  %v2146_v13 = vrot.slane %v2144_v43, 4  ;;  %v3340_v52 = vld [vmem:[%s4141_s6 + $0x3c] sm:$0xf] }
  0x85   : > { %v2149_v49 = vrot.slane %v2147_v56, 5  ;;  %v3284_v2 = vcombine.low %v4694_v33, %v4725_v59  ;;  %v4739_v54 = vsel %vm4318_vm7, %v1710_v60, %v1711_v45  ;;  %v4743_v10 = vsel %vm4318_vm7, %v3277_v12, %v1715_v41  ;;  %v3860_v33 = vld [vmem:[%s4141_s6 + $0x48] sm:$0xff]   ;;  %v3339_v60 = vld [vmem:[%s4141_s6 + $0x38] sm:$0x1] }
  0x86   : > { %v4754_v8 = vsel %vm4318_vm7, %v3278_v48, %v1722_v50  ;;  %v4758_v16 = vsel %vm4318_vm7, %v1724_v63, %v1725_v3  ;;  %v3380_v51 = vrot.slane %v3372_v53, 9  ;;  %v2127_v9 = vrot.slane %v2126_v7, 4  ;;  %v3374_v48 = vld [vmem:[%s4141_s6 + $0x30] sm:$0xe]  ;;  %v3861_v53 = vld [vmem:[%s4141_s6 + $0x54] sm:$0xff]  }
  0x87   : > { %3661 = vmatmul.mubr.msk.bf16.gmra.mxu1 %vm516_vm3, %v3855_v6  ;;  %v2514_v6 = vrot.slane %v3333_v15, 5  ;;  %v2513_v25 = vrot.slane %v2511_v28, 4  ;;  %v4769_v37 = vrot.slane %v2153_v22, 5  ;;  %v2159_v14 = vrot.slane %v2157_v39, 4 }
  0x88   : > { %3684 = vmatprep.mubr.msk.bf16.mxu1 %vm516_vm3, %v3280_v23  ;;  %v4750_v23 = vld [vmem:[%s4141_s6 + $0x2c] sm:$0x1]  ;;  %v2137_v58 = vrot.slane %v2136_v42, 4  ;;  %v2141_v41 = vrot.slane %v2139_v11, 5  ;;  %v2150_v29 = vor.u32 %v2149_v49, %v2146_v13  ;;  %v2177_v46 = vshll.u32 %v4762_v27, 16  ;;  %v3862_v11 = vld [vmem:[%s4141_s6 + $0x60] sm:$0xff]  }
  0x89   : > { %v2163_v34 = vshll.u32 %v4750_v23, 16  ;;  %v2181_v45 = vshrl.u32 %v4762_v27, 16  ;;  %v3287_v40 = vcombine.low %v4754_v8, %v4758_v16  ;;  %v2132_v50 = vsel %vm4182_vm4, %v2127_v9, %v4714_v62  ;;  %v4806_v62 = vld [vmem:[%s4141_s6 + $0x40] sm:$0xf] }
  0x8a   : > { %v2160_v12 = vor.u32 %v2159_v14, %v4769_v37  ;;  %v2518_v5 = vrot.slane %v4717_v55, 5  ;;  %v2142_v47 = vsel %vm4182_vm4, %v2137_v58, %v2141_v41  ;;  %v2151_v18 = vrot.slane %v2150_v29, 4  ;;  %v3375_v29 = vld [vmem:[%s4141_s6 + $0x3c] sm:$0xe] }
  0x8b   : > { %3703 = vmatmul.mubr.msk.bf16.vlgmr.msra.gmra.mxu0 %vm516_vm3, %v3857_v36  ;;  %v2171_v36 = vshll.u32 %v3337_v26, 16  ;;  %v2165_v43 = vrot.slane %v2163_v34, 5  ;;  %v3381_v56 = vrot.slane %v3373_v17, 9  ;;  %v4809_v15 = vrot.slane %v2177_v46, 5 }
  0x8c   : > { %3737 = vmatpush3.bf16.msra.mxu0 %v2616_v1  ;;  %3706 = vmatprep.mubr.msk.bf16.mxu0 %vm516_vm3, %v3858_v4  ;;  %v4747_v1 = vsel %vm4318_vm7, %v1717_v35, %v1718_v44  ;;  %v4797_v4 = vsel %vm4318_vm7, %v2513_v25, %v2514_v6  ;;  %v2183_v59 = vrot.slane %v2181_v45, 4  ;;  %v2521_v55 = vrot.slane %v4750_v23, 5  ;;  %v3343_v6 = vld [vmem:[%s4141_s6 + $0x48] sm:$0xf] }
  0x8d   : > { %v3286_v0 = vcombine.low %v4743_v10, %v4747_v1  ;;  %v2173_v44 = vrot.slane %v2171_v36, 5  ;;  %v2525_v63 = vrot.slane %v4762_v27, 5  ;;  %v2192_v3 = vshrl.u32 %v3340_v52, 16 }
  0x8e   : > { %v2195_v7 = vshll.u32 %v3340_v52, 16  ;;  %v2520_v22 = vrot.slane %v2518_v5, 4  ;;  %v2201_v39 = vshll.u32 %v4806_v62, 16  ;;  %v2205_v42 = vshrl.u32 %v4806_v62, 16 }
  0x8f   : > { %3685 = vmatmul.mubr.msk.bf16.vlgmr.msra.gmra.mxu1 %vm516_vm3, %v3281_v20  ;;  %v2168_v20 = vshrl.u32 %v3337_v26, 16  ;;  %v4823_v13 = vcombine.low %v2132_v50, %v2142_v47  ;;  %v2156_v24 = vsel %vm4182_vm4, %v2151_v18, %v4769_v37  ;;  %v4832_v19 = vsel %vm4318_vm7, %v3381_v56, %v2518_v5  ;;  %v4837_v26 = vld [vmem:[%s4141_s6 + $0x4c] sm:$0xf] }
  0x90   : > { %3719 = vmatpush3.bf16.msra.mxu1 %v4648_v61  ;;  %3688 = vmatprep.mubr.msk.bf16.mxu1 %vm516_vm3, %v3282_v38  ;;  %v3285_v61 = vcombine.low %v4710_v57, %v4739_v54  ;;  %v4789_v38 = vsel %vm4318_vm7, %v3380_v51, %v2511_v28  ;;  %v2161_v28 = vrot.slane %v2160_v12, 4  ;;  %v2184_v23 = vor.u32 %v2183_v59, %v4809_v15  ;;  %v3863_v47 = vld [vmem:[%s4141_s6 + $0x6c] sm:$0xff]  }
  0x91   : > { %v2170_v35 = vrot.slane %v2168_v20, 4  ;;  %v3389_v49 = vcombine.low %v4789_v38, %v4797_v4  ;;  %v3382_v51 = vrot.slane %v3374_v48, 9  ;;  %v2527_v27 = vrot.slane %v2525_v63, 4 }
  0x92   : > { %v2194_v9 = vrot.slane %v2192_v3, 4  ;;  %v2197_v25 = vrot.slane %v2195_v7, 5  ;;  %v2166_v37 = vsel %vm4182_vm4, %v2161_v28, %v2165_v43  ;;  %v4844_v14 = vsel %vm4318_vm7, %v2520_v22, %v2521_v55  ;;  %v3346_v55 = vld [vmem:[%s4141_s6 + $0x54] sm:$0xf] }
  0x93   : > { %3707 = vmatmul.mubr.msk.bf16.gmra.mxu0 %vm516_vm3, %v3859_v31  ;;  %v2528_v31 = vrot.slane %v3339_v60, 5  ;;  %v4847_v58 = vrot.slane %v2201_v39, 5  ;;  %v2207_v41 = vrot.slane %v2205_v42, 4  ;;  %v2216_v34 = vshrl.u32 %v3343_v6, 16  ;;  %v3349_v42 = vld [vmem:[%s4141_s6 + $0x60] sm:$0xf] }
  0x94   : > { %3710 = vmatprep.mubr.msk.bf16.mxu0 %vm516_vm3, %v3860_v33  ;;  %v3342_v33 = vld [vmem:[%s4141_s6 + $0x44] sm:$0x1]  ;;  %v2219_v17 = vshll.u32 %v3343_v6, 16  ;;  %v2225_v20 = vshll.u32 %v4837_v26, 16  ;;  %v2229_v36 = vshrl.u32 %v4837_v26, 16  ;;  %v4855_v45 = vrot.slane %v2184_v23, 4 }
  0x95   : > { %v4861_v50 = vsel %vm4318_vm7, %v3382_v51, %v2525_v63  ;;  %v4865_v4 = vsel %vm4318_vm7, %v2527_v27, %v2528_v31  ;;  %v2198_v12 = vor.u32 %v2197_v25, %v2194_v9  ;;  %v2211_v5 = vshll.u32 %v3342_v33, 16  ;;  %v4910_v23 = vld [vmem:[%s4141_s6 + $0x64] sm:$0xf] }
  0x96   : > { %v2532_v52 = vrot.slane %v4806_v62, 5  ;;  %v4873_v18 = vcombine.low %v2156_v24, %v2166_v37  ;;  %v3390_v43 = vcombine.low %v4832_v19, %v4844_v14  ;;  %v2208_v56 = vor.u32 %v2207_v41, %v4847_v58 }
  0x97   : > { %3689 = vmatmul.mubr.msk.bf16.gmra.mxu1 %vm516_vm3, %v3283_v32  ;;  %v2174_v32 = vor.u32 %v2173_v44, %v2170_v35  ;;  %v3345_v35 = vld [vmem:[%s4141_s6 + $0x50] sm:$0x1]  ;;  %v2218_v57 = vrot.slane %v2216_v34, 4  ;;  %v2221_v54 = vrot.slane %v2219_v17, 5  ;;  %v2231_v62 = vrot.slane %v2229_v36, 4 }
  0x98   : > { %3692 = vmatprep.mubr.msk.bf16.mxu1 %vm516_vm3, %v3284_v2  ;;  %v2187_v2 = vshll.u32 %v3339_v60, 16  ;;  %v3383_v60 = vrot.slane %v3375_v29, 9  ;;  %v3376_v44 = vld [vmem:[%s4141_s6 + $0x48] sm:$0xe]  ;;  %v3391_v1 = vcombine.low %v4861_v50, %v4865_v4  ;;  %v2199_v48 = vrot.slane %v2198_v12, 4 }
  0x99   : > { %v4853_v46 = vrot.slane %v2174_v32, 4  ;;  %v2213_v63 = vrot.slane %v2211_v5, 5  ;;  %v2534_v3 = vrot.slane %v2532_v52, 4  ;;  %v2535_v7 = vrot.slane %v3342_v33, 5  ;;  %v3348_v29 = vld [vmem:[%s4141_s6 + $0x5c] sm:$0x1] }
  0x9a   : > { %v4857_v38 = vrot.slane %v2187_v2, 5  ;;  %v4904_v28 = vsel %vm4318_vm7, %v3383_v60, %v2532_v52  ;;  %v2235_v22 = vshll.u32 %v3345_v35, 16  ;;  %v3384_v39 = vrot.slane %v3376_v44, 9  ;;  %v3351_v12 = vld [vmem:[%s4141_s6 + $0x68] sm:$0x1] }
  0x9b   : > { %3711 = vmatmul.mubr.msk.bf16.gmra.mxu0 %vm516_vm3, %v3861_v53  ;;  %v2180_v59 = vsel %vm4182_vm4, %v4853_v46, %v4809_v15  ;;  %v4899_v53 = vld [vmem:[%s4141_s6 + $0x58] sm:$0xf]  ;;  %v2209_v15 = vrot.slane %v2208_v56, 4  ;;  %v2542_v19 = vrot.slane %v3345_v35, 5  ;;  %v2240_v32 = vshrl.u32 %v3346_v55, 16 }
  0x9c   : > { %3714 = vmatprep.mubr.msk.bf16.mxu0 %vm516_vm3, %v3862_v11  ;;  %v2190_v10 = vsel %vm4182_vm4, %v4855_v45, %v4857_v38  ;;  %v2222_v11 = vor.u32 %v2221_v54, %v2218_v57  ;;  %v2243_v51 = vshll.u32 %v3346_v55, 16  ;;  %v2249_v6 = vshll.u32 %v4899_v53, 16  ;;  %v3377_v46 = vld [vmem:[%s4141_s6 + $0x54] sm:$0xe]  ;;  %v3352_v57 = vld [vmem:[%s4141_s6 + $0x6c] sm:$0xf] }
  0x9d   : > { %v2204_v27 = vsel %vm4182_vm4, %v2199_v48, %v4847_v58  ;;  %v2264_v31 = vshrl.u32 %v3349_v42, 16  ;;  %v2267_v9 = vshll.u32 %v3349_v42, 16  ;;  %v2214_v25 = vsel %vm4182_vm4, %v2209_v15, %v2213_v63 }
  0x9e   : > { %v2237_v37 = vrot.slane %v2235_v22, 5  ;;  %v2273_v14 = vshll.u32 %v4910_v23, 16  ;;  %v2277_v33 = vshrl.u32 %v4910_v23, 16  ;;  %v2223_v58 = vrot.slane %v2222_v11, 4 }
  0x9f   : > { %3693 = vmatmul.mubr.msk.bf16.gmra.mxu1 %vm516_vm3, %v3285_v61  ;;  %v4883_v61 = vrot.slane %v2225_v20, 5  ;;  %v2242_v16 = vrot.slane %v2240_v32, 4  ;;  %v2245_v34 = vrot.slane %v2243_v51, 5  ;;  %v4936_v17 = vrot.slane %v2249_v6, 5  ;;  %v3354_v6 = vld [vmem:[%s4141_s6 + $0x74] sm:$0x1] }
  0xa0   : > { %3696 = vmatprep.mubr.msk.bf16.mxu1 %vm516_vm3, %v3286_v0  ;;  %v2539_v0 = vrot.slane %v4837_v26, 5  ;;  %v2253_v26 = vshrl.u32 %v4899_v53, 16  ;;  %v3358_v36 = vcombine.low %v2180_v59, %v2190_v10  ;;  %v2266_v45 = vrot.slane %v2264_v31, 4  ;;  %v3353_v10 = vld [vmem:[%s4141_s6 + $0x70] sm:$0xf] }
  0xa1   : > { %v2232_v24 = vor.u32 %v2231_v62, %v4883_v61  ;;  %v2269_v38 = vrot.slane %v2267_v9, 5  ;;  %v3359_v50 = vcombine.low %v2204_v27, %v2214_v25  ;;  %v4944_v5 = vrot.slane %v2273_v14, 5  ;;  %v3379_v25 = vld [vmem:[%s4141_s6 + $0x6c] sm:$0xe] }
  0xa2   : > { %v2541_v2 = vrot.slane %v2539_v0, 4  ;;  %v2540_v8 = vsel %vm4318_vm7, %v3384_v39, %v2539_v0  ;;  %v2255_v20 = vrot.slane %v2253_v26, 4  ;;  %v2279_v52 = vrot.slane %v2277_v33, 4 }
  0xa3   : > { %3715 = vmatmul.mubr.msk.bf16.gmra.mxu0 %vm516_vm3, %v3863_v47  ;;  %v2233_v41 = vrot.slane %v2232_v24, 4  ;;  %v2228_v47 = vsel %vm4182_vm4, %v2223_v58, %v4883_v61  ;;  %v2553_v35 = vrot.slane %v4910_v23, 5  ;;  %v2246_v54 = vor.u32 %v2245_v34, %v2242_v16 }
  0xa4   : > { %3738 = vmatprep.mubr.msk.bf16.mxu0 %vm516_vm3, %v3389_v49  ;;  %v4919_v49 = vsel %vm4318_vm7, %v2534_v3, %v2535_v7  ;;  %v2256_v62 = vor.u32 %v2255_v20, %v4936_v17  ;;  %v2259_v44 = vshll.u32 %v3348_v29, 16  ;;  %v3385_v59 = vrot.slane %v3377_v46, 9 }
  0xa5   : > { %v3392_v4 = vcombine.low %v4904_v28, %v4919_v49  ;;  %v2238_v56 = vsel %vm4182_vm4, %v2233_v41, %v2237_v37  ;;  %v2270_v55 = vor.u32 %v2269_v38, %v2266_v45  ;;  %v2283_v48 = vshll.u32 %v3351_v12, 16 }
  0xa6   : > { %v2280_v61 = vor.u32 %v2279_v52, %v4944_v5  ;;  %v2288_v3 = vshrl.u32 %v3352_v57, 16  ;;  %v2291_v7 = vshll.u32 %v3352_v57, 16  ;;  %v2556_v15 = vrot.slane %v3351_v12, 5 }
  0xa7   : > { %3697 = vmatmul.mubr.msk.bf16.gmra.mxu1 %vm516_vm3, %v3287_v40  ;;  %v2543_v40 = vsel %vm4318_vm7, %v2541_v2, %v2542_v19  ;;  %v2297_v28 = vshll.u32 %v3353_v10, 16  ;;  %v2301_v22 = vshrl.u32 %v3353_v10, 16  ;;  %v3360_v39 = vcombine.low %v2228_v47, %v2238_v56 }
  0xa8   : > { %3720 = vmatprep.mubr.msk.bf16.mxu1 %vm516_vm3, %v4823_v13  ;;  %v2546_v13 = vrot.slane %v4899_v53, 5  ;;  %v3393_v60 = vcombine.low %v2540_v8, %v2543_v40  ;;  %v2555_v53 = vrot.slane %v2553_v35, 4  ;;  %v2247_v42 = vrot.slane %v2246_v54, 4 }
  0xa9   : > { %v2257_v11 = vrot.slane %v2256_v62, 4  ;;  %v2261_v24 = vrot.slane %v2259_v44, 5  ;;  %v2271_v32 = vrot.slane %v2270_v55, 4  ;;  %v2285_v23 = vrot.slane %v2283_v48, 5 }
  0xaa   : > { %v2548_v0 = vrot.slane %v2546_v13, 4  ;;  %v2281_v2 = vrot.slane %v2280_v61, 4  ;;  %v2290_v26 = vrot.slane %v2288_v3, 4  ;;  %v2293_v27 = vrot.slane %v2291_v7, 5 }
  0xab   : > { %3739 = vmatmul.mubr.msk.bf16.vlgmr.msra.gmra.mxu0 %vm516_vm3, %v3390_v43  ;;  %v3378_v43 = vld [vmem:[%s4141_s6 + $0x60] sm:$0xe]  ;;  %v2557_v49 = vsel %vm4318_vm7, %v2555_v53, %v2556_v15  ;;  %v2299_v31 = vrot.slane %v2297_v28, 5  ;;  %v2303_v9 = vrot.slane %v2301_v22, 4  ;;  %v2560_v37 = vrot.slane %v3353_v10, 5  ;;  %s5325_s6 = scalar_lea.sflag [#allocation3], %s246_s11 }
  0xac   : > { %3742 = vmatprep.mubr.msk.bf16.mxu0 %vm516_vm3, %v3391_v1  ;;  %v2549_v1 = vrot.slane %v3348_v29, 5  ;;  %v3386_v63 = vrot.slane %v3378_v43, 9  ;;  %v2252_v14 = vsel %vm4182_vm4, %v2247_v42, %v4936_v17  ;;  %v2262_v33 = vsel %vm4182_vm4, %v2257_v11, %v2261_v24 }
  0xad   : > { %v2276_v41 = vsel %vm4182_vm4, %v2271_v32, %v4944_v5  ;;  %v2286_v8 = vsel %vm4182_vm4, %v2281_v2, %v2285_v23  ;;  %v2307_v40 = vshll.u32 %v3354_v6, 16  ;;  %v3387_v29 = vrot.slane %v3379_v25, 9 }
  0xae   : > { %v2550_v19 = vsel %vm4318_vm7, %v2548_v0, %v2549_v1  ;;  %v2554_v51 = vsel %vm4318_vm7, %v3386_v63, %v2553_v35  ;;  %v2294_v34 = vor.u32 %v2293_v27, %v2290_v26  ;;  %v2304_v17 = vor.u32 %v2303_v9, %v2299_v31 }
  0xaf   : > { %3721 = vmatmul.mubr.msk.bf16.vlgmr.msra.gmra.mxu1 %vm516_vm3, %v4873_v18  ;;  %v2547_v18 = vsel %vm4318_vm7, %v3385_v59, %v2546_v13  ;;  %v3395_v16 = vcombine.low %v2554_v51, %v2557_v49  ;;  %v2562_v20 = vrot.slane %v2560_v37, 4  ;;  %v3361_v46 = vcombine.low %v2252_v14, %v2262_v33 }
  0xb0   : > { %3724 = vmatprep.mubr.msk.bf16.mxu1 %vm516_vm3, %v3358_v36  ;;  %v3394_v58 = vcombine.low %v2547_v18, %v2550_v19  ;;  %v2563_v36 = vrot.slane %v3354_v6, 5  ;;  %v3362_v13 = vcombine.low %v2276_v41, %v2286_v8  ;;  %v2309_v45 = vrot.slane %v2307_v40, 5 }
  0xb1   : > { %v2295_v38 = vrot.slane %v2294_v34, 4 }
  0xb2   : > { %v2564_v12 = vsel %vm4318_vm7, %v2562_v20, %v2563_v36 }
  0xb3   : > { %3743 = vmatmul.mubr.msk.bf16.gmra.mxu0 %vm516_vm3, %v3392_v4  ;;  %v2561_v4 = vsel %vm4318_vm7, %v3387_v29, %v2560_v37  ;;  %v2300_v52 = vsel %vm4182_vm4, %v2295_v38, %v2299_v31 }
  0xb4   : > { %3746 = vmatprep.mubr.msk.bf16.mxu0 %vm516_vm3, %v3393_v60  ;;  %v3396_v5 = vcombine.low %v2561_v4, %v2564_v12 }
  0xb7   : > { %3725 = vmatmul.mubr.msk.bf16.gmra.mxu1 %vm516_vm3, %v3359_v50  ;;  %v2305_v50 = vrot.slane %v2304_v17, 4 }
  0xb8   : > { %3728 = vmatprep.mubr.msk.bf16.mxu1 %vm516_vm3, %v3360_v39 }
  0xb9   : > { %v2310_v47 = vsel %vm4182_vm4, %v2305_v50, %v2309_v45 }
  0xba   : > { %v3363_v56 = vcombine.low %v2300_v52, %v2310_v47 }
  0xbb   : > { %3747 = vmatmul.mubr.msk.bf16.gmra.mxu0 %vm516_vm3, %v3394_v58 }
  0xbc   : > { %3750 = vmatprep.mubr.msk.bf16.mxu0 %vm516_vm3, %v3395_v16 }
  0xbf   : > { %3729 = vmatmul.mubr.msk.bf16.gmra.mxu1 %vm516_vm3, %v3361_v46 }
  0xc0   : > { %3732 = vmatprep.mubr.msk.bf16.mxu1 %vm516_vm3, %v3362_v13 }
  0xc3   : > { %3751 = vmatmul.mubr.msk.bf16.gmra.mxu0 %vm516_vm3, %v3396_v5 }
  0xc7   : > { %3733 = vmatmul.mubr.msk.bf16.gmra.mxu1 %vm516_vm3, %v3363_v56 }
  0xf2   : > { %v3596_v60 = vpop.f32.mrf.mxu0 }
  0xf4   : > { %v579_v21 = vpop.f32.mrf.mxu0 }
  0xf6   : > { %v3597_v57 = vpop.f32.mrf.mxu0 }
  0xf7   : > { %v3604_v43 = vpop.f32.mrf.mxu1 }
  0xf8   : > { %v582_v62 = vpop.f32.mrf.mxu0 }
  0xf9   : > { %v611_v35 = vpop.f32.mrf.mxu1 }
  0xfb   : > { %v3605_v54 = vpop.f32.mrf.mxu1 }
  0xfd   : > { %v614_v44 = vpop.f32.mrf.mxu1 }
 0x103   : > { %v3600_v59 = vpop.f32.mrf.mxu0 }
 0x105   : > { %v595_v10 = vpop.f32.mrf.mxu0 }
 0x107   : > { %v3608_v0 = vpop.f32.mrf.mxu1  ;;  %v3601_v1 = vpop.f32.mrf.mxu0 }
 0x109   : > { %v627_v55 = vpop.f32.mrf.mxu1  ;;  %v598_v30 = vpop.f32.mrf.mxu0 }
 0x10b   : > { %v3609_v48 = vpop.f32.mrf.mxu1  ;;  %v3632_v61 = vpop.f32.mrf.mxu0 }
 0x10d   : > { %v4999_v63 = vpop.f32.mrf.mxu1  ;;  %v976_v3 = vpop.f32.mrf.mxu0 }
 0x10f   : > { %v3614_v7 = vpop.f32.mrf.mxu1  ;;  %v3633_v53 = vpop.f32.mrf.mxu0 }
 0x110   : > { %v752_v15 = vadd.f32 %v3614_v7, %v3596_v60 }
 0x111   : > { %v743_v28 = vpop.f32.mrf.mxu1  ;;  %v979_v22 = vpop.f32.mrf.mxu0 }
 0x112   : > { %v5001_v39 = vadd.f32 %v3632_v61, %v752_v15  ;;  %v744_v42 = vadd.f32 %v743_v28, %v579_v21 }
 0x113   : > { %v3615_v11 = vpop.f32.mrf.mxu1  ;;  %v3636_v24 = vpop.f32.mrf.mxu0 }
 0x114   : > { %v5003_v18 = vadd.f32 %v976_v3, %v744_v42  ;;  %v755_v19 = vadd.f32 %v3615_v11, %v3597_v57 }
 0x115   : > { %v746_v32 = vpop.f32.mrf.mxu1  ;;  %v992_v23 = vpop.f32.mrf.mxu0 }
 0x116   : > { %v5005_v2 = vadd.f32 %v3633_v53, %v755_v19  ;;  %v747_v51 = vadd.f32 %v746_v32, %v582_v62 }
 0x117   : > { %v3618_v6 = vpop.f32.mrf.mxu1  ;;  %v3637_v26 = vpop.f32.mrf.mxu0 }
 0x118   : > { %v5007_v27 = vadd.f32 %v979_v22, %v747_v51  ;;  %v768_v49 = vadd.f32 %v3618_v6, %v3600_v59 }
 0x119   : > { %v759_v31 = vpop.f32.mrf.mxu1  ;;  %v995_v9 = vpop.f32.mrf.mxu0 }
 0x11a   : > { %v5009_v25 = vadd.f32 %v3636_v24, %v768_v49  ;;  %v760_v37 = vadd.f32 %v759_v31, %v595_v10 }
 0x11b   : > { %v3619_v14 = vpop.f32.mrf.mxu1  ;;  %v3640_v33 = vpop.f32.mrf.mxu0 }
 0x11c   : > { %v5011_v58 = vadd.f32 %v992_v23, %v760_v37  ;;  %v771_v41 = vadd.f32 %v3619_v14, %v3601_v1 }
 0x11d   : > { %v762_v8 = vpop.f32.mrf.mxu1  ;;  %v1008_v16 = vpop.f32.mrf.mxu0 }
 0x11e   : > { %v5013_v40 = vadd.f32 %v3637_v26, %v771_v41  ;;  %v763_v29 = vadd.f32 %v762_v8, %v598_v30 }
 0x11f   : > { %v3622_v34 = vpop.f32.mrf.mxu1  ;;  %v3641_v17 = vpop.f32.mrf.mxu0 }
 0x120   : > { %v5015_v20 = vadd.f32 %v995_v9, %v763_v29  ;;  %v784_v36 = vadd.f32 %v3622_v34, %v3604_v43 }
 0x121   : > { %v775_v46 = vpop.f32.mrf.mxu1  ;;  %v1011_v13 = vpop.f32.mrf.mxu0 }
 0x122   : > { %v5017_v45 = vadd.f32 %v3640_v33, %v784_v36  ;;  %v776_v38 = vadd.f32 %v775_v46, %v611_v35 }
 0x123   : > { %v3623_v50 = vpop.f32.mrf.mxu1  ;;  %v3644_v4 = vpop.f32.mrf.mxu0 }
 0x124   : > { %v5019_v12 = vadd.f32 %v1008_v16, %v776_v38  ;;  %v787_v5 = vadd.f32 %v3623_v50, %v3605_v54 }
 0x125   : > { %v778_v52 = vpop.f32.mrf.mxu1  ;;  %v1024_v47 = vpop.f32.mrf.mxu0 }
 0x126   : > { %v5021_v56 = vadd.f32 %v3641_v17, %v787_v5  ;;  %v779_v60 = vadd.f32 %v778_v52, %v614_v44 }
 0x127   : > { %v3626_v21 = vpop.f32.mrf.mxu1  ;;  %v3645_v57 = vpop.f32.mrf.mxu0 }
 0x128   : > { %v5023_v62 = vadd.f32 %v1011_v13, %v779_v60  ;;  %v800_v43 = vadd.f32 %v3626_v21, %v3608_v0 }
 0x129   : > { %v791_v59 = vpop.f32.mrf.mxu1  ;;  %v1027_v10 = vpop.f32.mrf.mxu0 }
 0x12a   : > { %v5025_v1 = vadd.f32 %v3644_v4, %v800_v43  ;;  %v792_v35 = vadd.f32 %v791_v59, %v627_v55 }
 0x12b   : > { %v3627_v30 = vpop.f32.mrf.mxu1  ;;  %v5027_v61 = vpop.f32.mrf.mxu0 }
 0x12c   : > { %v5029_v3 = vadd.f32 %v1024_v47, %v792_v35  ;;  %v803_v54 = vadd.f32 %v3627_v30, %v3609_v48 }
 0x12d   : > { %v794_v7 = vpop.f32.mrf.mxu1  ;;  %v5031_v53 = vpop.f32.mrf.mxu0 }
 0x12e   : > { %v5033_v44 = vadd.f32 %v3645_v57, %v803_v54  ;;  %v795_v15 = vadd.f32 %v794_v7, %v4999_v63 }
 0x12f   : > { %v3650_v28 = vpop.f32.mrf.mxu1  ;;  %v5036_v0 = vpop.f32.mrf.mxu0 }
 0x130   : > { %v5038_v22 = vadd.f32 %v1027_v10, %v795_v15 }
 0x131   : > { %v1178_v42 = vpop.f32.mrf.mxu1  ;;  %v5040_v55 = vpop.f32.mrf.mxu0 }
 0x133   : > { %v3651_v11 = vpop.f32.mrf.mxu1  ;;  %v5042_v24 = vpop.f32.mrf.mxu0 }
 0x135   : > { %v1181_v19 = vpop.f32.mrf.mxu1  ;;  %v5044_v48 = vpop.f32.mrf.mxu0 }
 0x137   : > { %v3654_v32 = vpop.f32.mrf.mxu1  ;;  %v5046_v23 = vpop.f32.mrf.mxu0 }
 0x139   : > { %v1194_v51 = vpop.f32.mrf.mxu1  ;;  %v5048_v6 = vpop.f32.mrf.mxu0 }
 0x13b   : > { %v3655_v63 = vpop.f32.mrf.mxu1  ;;  %v5050_v26 = vpop.f32.mrf.mxu0 }
 0x13d   : > { %v1197_v49 = vpop.f32.mrf.mxu1  ;;  %v5052_v31 = vpop.f32.mrf.mxu0 }
 0x13f   : > { %v3658_v9 = vpop.f32.mrf.mxu1  ;;  %v5054_v37 = vpop.f32.mrf.mxu0 }
 0x141   : > { %v1210_v14 = vpop.f32.mrf.mxu1  ;;  %v5056_v33 = vpop.f32.mrf.mxu0 }
 0x143   : > { %v3659_v41 = vpop.f32.mrf.mxu1  ;;  %v5058_v8 = vpop.f32.mrf.mxu0 }
 0x144   : > { %5387 = vst [vmem:[#allocation5_spill] sm:$0xff] %v5058_v8 }
 0x145   : > { %v1213_v16 = vpop.f32.mrf.mxu1  ;;  %v5060_v29 = vpop.f32.mrf.mxu0 }
 0x146   : > { %5388 = vst [vmem:[#allocation6_spill] sm:$0xff] %v5060_v29 }
 0x147   : > { %v5062_v34 = vpop.f32.mrf.mxu1  ;;  %v5064_v17 = vpop.f32.mrf.mxu0 }
 0x148   : > { %5389 = vst [vmem:[#allocation7_spill] sm:$0xff] %v5064_v17 }
 0x149   : > { %v5066_v36 = vpop.f32.mrf.mxu1  ;;  %v5068_v46 = vpop.f32.mrf.mxu0 }
 0x14a   : > { %5390 = vst [vmem:[#allocation8_spill] sm:$0xff] %v5068_v46 }
 0x14b   : > { %v5070_v13 = vpop.f32.mrf.mxu1  ;;  %v3704_v38 = vpop.f32.mrf.mxu0 }
 0x14d   : > { %v5072_v50 = vpop.f32.mrf.mxu1  ;;  %v2016_v4 = vpop.f32.mrf.mxu0 }
 0x14f   : > { %v3686_v5 = vpop.f32.mrf.mxu1  ;;  %v5074_v52 = vpop.f32.mrf.mxu0 }
 0x151   : > { %v1814_v47 = vpop.f32.mrf.mxu1  ;;  %v5076_v60 = vpop.f32.mrf.mxu0 }
 0x152   : > { %5391 = vst [vmem:[#allocation9_spill] sm:$0xff] %v5076_v60 }
 0x153   : > { %v3687_v21 = vpop.f32.mrf.mxu1  ;;  %v5078_v57 = vpop.f32.mrf.mxu0 }
 0x154   : > { %5392 = vst [vmem:[#allocation10_spill] sm:$0xff] %v5078_v57 }
 0x155   : > { %v1817_v43 = vpop.f32.mrf.mxu1  ;;  %v5080_v59 = vpop.f32.mrf.mxu0 }
 0x156   : > { %5393 = vst [vmem:[#allocation11_spill] sm:$0xff] %v5080_v59 }
 0x157   : > { %v5082_v10 = vpop.f32.mrf.mxu1  ;;  %v5084_v35 = vpop.f32.mrf.mxu0 }
 0x158   : > { %5394 = vst [vmem:[#allocation12_spill] sm:$0xff] %v5084_v35 }
 0x159   : > { %v5086_v30 = vpop.f32.mrf.mxu1  ;;  %v5088_v54 = vpop.f32.mrf.mxu0 }
 0x15a   : > { %5395 = vst [vmem:[#allocation13_spill] sm:$0xff] %v5088_v54  ;;  %v1243_v54 = vadd.f32 %v3650_v28, %v5001_v39  ;;  %v1242_v28 = vadd.f32 %v1181_v19, %v5007_v27  ;;  %v1252_v27 = vadd.f32 %v3659_v41, %v5021_v56 }
 0x15b   : > { %v5090_v7 = vpop.f32.mrf.mxu1  ;;  %v5092_v15 = vpop.f32.mrf.mxu0 }
 0x15c   : > { %5396 = vst [vmem:[#allocation14_spill] sm:$0xff] %v5090_v7  ;;  %5397 = vst [vmem:[#allocation15_spill] sm:$0xff] %v5092_v15 }
 0x15d   : > { %v5094_v46 = vpop.f32.mrf.mxu1  ;;  %v5096_v17 = vpop.f32.mrf.mxu0 }
 0x15e   : > { %5398 = vst [vmem:[#allocation16_spill] sm:$0xff] %v5094_v46  ;;  %5399 = vst [vmem:[#allocation17_spill] sm:$0xff] %v5096_v17  ;;  %v1241_v17 = vadd.f32 %v1178_v42, %v5003_v18  ;;  %v1245_v18 = vadd.f32 %v1194_v51, %v5011_v58  ;;  %v1248_v42 = vadd.f32 %v3655_v63, %v5013_v40 }
 0x15f   : > { %v5098_v57 = vpop.f32.mrf.mxu1  ;;  %v5100_v29 = vpop.f32.mrf.mxu0  ;;  %v1624_v58 = vadd.f32 %v5040_v55, %v1242_v28  ;;  %v1250_v40 = vadd.f32 %v1213_v16, %v5023_v62  ;;  %v1634_v62 = vadd.f32 %v5054_v37, %v1252_v27  ;;  %v1256_v37 = vadd.f32 %v5070_v13, %v5033_v44  ;;  %v5410_v13 = vld [vmem:[#allocation5_spill] sm:$0xff]  ;;  %v5417_v27 = vld [vmem:[#allocation11_spill] sm:$0xff] }
 0x160   : > { %5400 = vst [vmem:[#allocation18_spill] sm:$0xff] %v5098_v57  ;;  %5401 = vst [vmem:[#allocation19_spill] sm:$0xff] %v5100_v29  ;;  %v1625_v29 = vadd.f32 %v5027_v61, %v1243_v54  ;;  %v1623_v39 = vadd.f32 %v5031_v53, %v1241_v17  ;;  %v1251_v54 = vadd.f32 %v3658_v9, %v5017_v45  ;;  %v5169_v17 = vld [vmem:[%s5379_s3] ss:$0 sm:$0xff] }
 0x161   : > { %v5102_v59 = vpop.f32.mrf.mxu1  ;;  %v5104_v8 = vpop.f32.mrf.mxu0  ;;  %v1249_v53 = vadd.f32 %v1210_v14, %v5019_v12  ;;  %v1630_v45 = vadd.f32 %v5046_v23, %v1248_v42  ;;  %v1878_v14 = vadd.f32 %v1817_v43, %v1624_v58  ;;  %v5156_v23 = vld [vmem:[%s5378_s2] ss:$0 sm:$0xff] }
 0x162   : > { %5402 = vst [vmem:[#allocation20_spill] sm:$0xff] %v5102_v59  ;;  %5403 = vst [vmem:[#allocation21_spill] sm:$0xff] %v5104_v8  ;;  %v1244_v8 = vadd.f32 %v3651_v11, %v5005_v2  ;;  %v1633_v56 = vadd.f32 %v5050_v26, %v1251_v54  ;;  %v5416_v54 = vld [vmem:[#allocation10_spill] sm:$0xff] }
 0x163   : > { %v5106_v35 = vpop.f32.mrf.mxu1  ;;  %v5108_v60 = vpop.f32.mrf.mxu0  ;;  %v1631_v55 = vadd.f32 %v5052_v31, %v1249_v53 }
 0x164   : > { %5404 = vst [vmem:[#allocation22_spill] sm:$0xff] %v5106_v35  ;;  %5405 = vst [vmem:[#allocation23_spill] sm:$0xff] %v5108_v60  ;;  %v1879_v60 = vadd.f32 %v3686_v5, %v1625_v29  ;;  %v1626_v11 = vadd.f32 %v5036_v0, %v1244_v8  ;;  %v1627_v0 = vadd.f32 %v5044_v48, %v1245_v18  ;;  %v5414_v18 = vld [vmem:[#allocation7_spill] sm:$0xff] }
 0x165   : > { %v5111_v7 = vpop.f32.mrf.mxu1  ;;  %v5113_v15 = vpop.f32.mrf.mxu0  ;;  %v1253_v48 = vadd.f32 %v5066_v36, %v5029_v3  ;;  %v1632_v8 = vadd.f32 %v5056_v33, %v1250_v40  ;;  %v1638_v42 = vadd.f32 %v5414_v18, %v1256_v37 }
 0x166   : > { %5406 = vst [vmem:[#allocation24_spill] sm:$0xff] %v5113_v15  ;;  %v1247_v15 = vadd.f32 %v3654_v32, %v5009_v25  ;;  %v1880_v32 = vadd.f32 %v3687_v21, %v1626_v11 }
 0x167   : > { %v5116_v46 = vpop.f32.mrf.mxu1  ;;  %v5118_v57 = vpop.f32.mrf.mxu0 }
 0x168   : > { %5407 = vst [vmem:[#allocation25_spill] sm:$0xff] %v5118_v57  ;;  %v1246_v57 = vadd.f32 %v1197_v49, %v5015_v20  ;;  %v2081_v20 = vadd.f32 %v3704_v38, %v1879_v60  ;;  %v1629_v51 = vadd.f32 %v5042_v24, %v1247_v15  ;;  %v1255_v24 = vadd.f32 %v5062_v34, %v5025_v1  ;;  %v5409_v38 = vld [vmem:[#allocation9_spill] sm:$0xff]  ;;  %v5412_v60 = vld [vmem:[#allocation14_spill] sm:$0xff] }
 0x169   : > { %v5122_v59 = vpop.f32.mrf.mxu1  ;;  %v5124_v35 = vpop.f32.mrf.mxu0  ;;  %v2082_v16 = vadd.f32 %v5074_v52, %v1880_v32  ;;  %v1254_v1 = vadd.f32 %v5072_v50, %v5038_v22  ;;  %v1881_v34 = vadd.f32 %v5086_v30, %v1627_v0  ;;  %v5411_v22 = vld [vmem:[#allocation6_spill] sm:$0xff]  ;;  %v1884_v21 = vadd.f32 %v5412_v60, %v1630_v45  ;;  %v5418_v45 = vld [vmem:[#allocation12_spill] sm:$0xff] }
 0x16a   : > { %5408 = vst [vmem:[#allocation26_spill] sm:$0xff] %v5124_v35  ;;  %v1877_v35 = vadd.f32 %v1814_v47, %v1623_v39  ;;  %v1628_v63 = vadd.f32 %v5048_v6, %v1246_v57  ;;  %v1883_v3 = vadd.f32 %v5082_v10, %v1629_v51  ;;  %v1637_v47 = vadd.f32 %v5410_v13, %v1255_v24  ;;  %v5413_v57 = vld [vmem:[#allocation16_spill] sm:$0xff] }
 0x16b   : > { %v5132_v61 = vpop.f32.mrf.mxu1  ;;  %v3740_v2 = vpop.f32.mrf.mxu0  ;;  %v5175_v50 = vadd.f32 %v5411_v22, %v1253_v48  ;;  %v1886_v13 = vadd.f32 %v5111_v7, %v1632_v8 }
 0x16c   : > { %v2079_v9 = vadd.f32 %v2016_v4, %v1877_v35  ;;  %v2080_v4 = vadd.f32 %v5409_v38, %v1878_v14  ;;  %v1882_v43 = vadd.f32 %v5413_v57, %v1628_v63  ;;  %v2085_v53 = vadd.f32 %v5416_v54, %v1883_v3 }
 0x16d   : > { %v5138_v19 = vpop.f32.mrf.mxu1  ;;  %v2652_v25 = vpop.f32.mrf.mxu0  ;;  %v2086_v63 = vadd.f32 %v5418_v45, %v1884_v21 }
 0x16f   : > { %v3722_v12 = vpop.f32.mrf.mxu1  ;;  %v3741_v49 = vpop.f32.mrf.mxu0 }
 0x170   : > { %v2463_v41 = vadd.f32 %v3722_v12, %v2081_v20  ;;  %v5419_v12 = vld [vmem:[#allocation13_spill] sm:$0xff] }
 0x171   : > { %v2398_v6 = vpop.f32.mrf.mxu1  ;;  %v2655_v26 = vpop.f32.mrf.mxu0 }
 0x172   : > { %v2717_v31 = vadd.f32 %v3740_v2, %v2463_v41  ;;  %v2461_v29 = vadd.f32 %v2398_v6, %v2079_v9  ;;  %v5415_v2 = vld [vmem:[#allocation8_spill] sm:$0xff]  ;;  %v5420_v9 = vld [vmem:[#allocation18_spill] sm:$0xff] }
 0x173   : > { %v3723_v33 = vpop.f32.mrf.mxu1  ;;  %v3744_v36 = vpop.f32.mrf.mxu0  ;;  %v5185_v11 = vadd.f32 %v5415_v2, %v1254_v1  ;;  %v1887_v14 = vadd.f32 %v5420_v9, %v1633_v56  ;;  %v1892_v9 = vadd.f32 %v5132_v61, %v1638_v42 }
 0x174   : > { %v2740_v5 = vmul.f32 %v5156_v23, %v2717_v31  ;;  %v2715_v52 = vadd.f32 %v2652_v25, %v2461_v29  ;;  %v2464_v44 = vadd.f32 %v3723_v33, %v2082_v16  ;;  %v2083_v25 = vadd.f32 %v5417_v27, %v1881_v34  ;;  %v5421_v29 = vld [vmem:[#allocation20_spill] sm:$0xff] }
 0x175   : > { %v2401_v10 = vpop.f32.mrf.mxu1  ;;  %v2668_v35 = vpop.f32.mrf.mxu0  ;;  %v1885_v37 = vadd.f32 %v5421_v29, %v1631_v55 }
 0x176   : > { %v5180_v30 = vadd.f32 %v5169_v17, %v2740_v5  ;;  %v2738_v15 = vmul.f32 %v5156_v23, %v2715_v52  ;;  %v2718_v39 = vadd.f32 %v3741_v49, %v2464_v44  ;;  %v2462_v28 = vadd.f32 %v2401_v10, %v2080_v4  ;;  %v5423_v52 = vld [vmem:[#allocation15_spill] sm:$0xff] }
 0x177   : > { %v3726_v58 = vpop.f32.mrf.mxu1  ;;  %v3745_v40 = vpop.f32.mrf.mxu0  ;;  %v2084_v49 = vadd.f32 %v5419_v12, %v1882_v43  ;;  %v2089_v44 = vadd.f32 %v5423_v52, %v1887_v14  ;;  %v5424_v43 = vld [vmem:[#allocation17_spill] sm:$0xff] }
 0x178   : > { %v3409_v20 = vmul.f32 -1.442695, %v5180_v30  ;;  %v5191_v32 = vadd.f32 %v5169_v17, %v2738_v15  ;;  %v2741_v51 = vmul.f32 %v5156_v23, %v2718_v39  ;;  %v2716_v0 = vadd.f32 %v2655_v26, %v2462_v28  ;;  %v5422_v26 = vld [vmem:[#allocation22_spill] sm:$0xff]  ;;  %v5425_v15 = vld [vmem:[#allocation19_spill] sm:$0xff] }
 0x179   : > { %v2467_v41 = vadd.f32 %v3726_v58, %v2085_v53  ;;  %v2414_v24 = vpop.f32.mrf.mxu1  ;;  %v2671_v48 = vpop.f32.mrf.mxu0  ;;  %v1888_v1 = vadd.f32 %v5422_v26, %v1634_v62  ;;  %v2087_v10 = vadd.f32 %v5424_v43, %v1885_v37  ;;  %v5426_v53 = vld [vmem:[#allocation21_spill] sm:$0xff] }
 0x17a   : > { %3864 = vpow2.f32 %v3409_v20  ;;  %v3407_v6 = vmul.f32 -1.442695, %v5191_v32  ;;  %v5199_v16 = vadd.f32 %v5169_v17, %v2741_v51  ;;  %v2739_v31 = vmul.f32 %v5156_v23, %v2716_v0 }
 0x17b   : > { %v2721_v3 = vadd.f32 %v3744_v36, %v2467_v41  ;;  %v2465_v34 = vadd.f32 %v2414_v24, %v2083_v25  ;;  %v3727_v33 = vpop.f32.mrf.mxu1  ;;  %v3748_v38 = vpop.f32.mrf.mxu0  ;;  %v2090_v39 = vadd.f32 %v5425_v15, %v1888_v1  ;;  %v2088_v27 = vadd.f32 %v5426_v53, %v1886_v13 }
 0x17c   : > { %3866 = vpow2.f32 %v3407_v6  ;;  %v3410_v56 = vmul.f32 -1.442695, %v5199_v16  ;;  %v5206_v4 = vadd.f32 %v5169_v17, %v2739_v31  ;;  %v2468_v5 = vadd.f32 %v3727_v33, %v2086_v63  ;;  %v5427_v31 = vld [vmem:[#allocation23_spill] sm:$0xff]  ;;  %v5429_v33 = vld [vmem:[#allocation25_spill] sm:$0xff] }
 0x17d   : > { %v2744_v22 = vmul.f32 %v5156_v23, %v2721_v3  ;;  %v2719_v55 = vadd.f32 %v2668_v35, %v2465_v34  ;;  %v2417_v60 = vpop.f32.mrf.mxu1  ;;  %v2684_v62 = vpop.f32.mrf.mxu0  ;;  %v1891_v25 = vadd.f32 %v5116_v46, %v1637_v47  ;;  %v5428_v3 = vld [vmem:[#allocation24_spill] sm:$0xff] }
 0x17e   : > { %3868 = vpow2.f32 %v3410_v56  ;;  %v3408_v36 = vmul.f32 -1.442695, %v5206_v4  ;;  %v2722_v21 = vadd.f32 %v3745_v40, %v2468_v5  ;;  %v2466_v57 = vadd.f32 %v2417_v60, %v2084_v49 }
 0x17f   : > { %v5215_v28 = vadd.f32 %v5169_v17, %v2744_v22  ;;  %v2742_v18 = vmul.f32 %v5156_v23, %v2719_v55  ;;  %v3730_v7 = vpop.f32.mrf.mxu1  ;;  %v3749_v8 = vpop.f32.mrf.mxu0  ;;  %v1889_v49 = vadd.f32 %v5122_v59, %v5175_v50  ;;  %v2093_v29 = vadd.f32 %v5427_v31, %v1891_v25  ;;  %v5430_v55 = vld [vmem:[#allocation26_spill] sm:$0xff] }
 0x180   : > { %3870 = vpow2.f32 %v3408_v36  ;;  %v2745_v35 = vmul.f32 %v5156_v23, %v2722_v21  ;;  %v2720_v2 = vadd.f32 %v2671_v48, %v2466_v57  ;;  %v2471_v54 = vadd.f32 %v3730_v7, %v2089_v44 }
 0x181   : > { %v3413_v58 = vmul.f32 -1.442695, %v5215_v28  ;;  %v5223_v40 = vadd.f32 %v5169_v17, %v2742_v18  ;;  %v2430_v20 = vpop.f32.mrf.mxu1  ;;  %v2687_v51 = vpop.f32.mrf.mxu0  ;;  %v1890_v59 = vadd.f32 %v5138_v19, %v5185_v11  ;;  %v2091_v34 = vadd.f32 %v5428_v3, %v1889_v49 }
 0x182   : > { %v5226_v0 = vadd.f32 %v5169_v17, %v2745_v35  ;;  %v2743_v45 = vmul.f32 %v5156_v23, %v2720_v2  ;;  %v2725_v63 = vadd.f32 %v3748_v38, %v2471_v54  ;;  %v2469_v12 = vadd.f32 %v2430_v20, %v2087_v10 }
 0x183   : > { %3872 = vpow2.f32 %v3413_v58  ;;  %v3411_v46 = vmul.f32 -1.442695, %v5223_v40  ;;  %v3731_v47 = vpop.f32.mrf.mxu1  ;;  %v3752_v6 = vpop.f32.mrf.mxu0  ;;  %v2094_v38 = vadd.f32 %v5429_v33, %v1892_v9  ;;  %v2092_v60 = vadd.f32 %v5430_v55, %v1890_v59 }
 0x184   : > { %v3414_v14 = vmul.f32 -1.442695, %v5226_v0  ;;  %v5235_v41 = vadd.f32 %v5169_v17, %v2743_v45  ;;  %v2748_v24 = vmul.f32 %v5156_v23, %v2725_v63  ;;  %v2723_v48 = vadd.f32 %v2684_v62, %v2469_v12 }
 0x185   : > { %3874 = vpow2.f32 %v3411_v46  ;;  %v2472_v61 = vadd.f32 %v3731_v47, %v2090_v39  ;;  %v2433_v50 = vpop.f32.mrf.mxu1  ;;  %v2700_v13 = vpop.f32.mrf.mxu0 }
 0x186   : > { %3876 = vpow2.f32 %v3414_v14  ;;  %v3412_v42 = vmul.f32 -1.442695, %v5235_v41  ;;  %v5243_v37 = vadd.f32 %v5169_v17, %v2748_v24  ;;  %v2746_v26 = vmul.f32 %v5156_v23, %v2723_v48 }
 0x187   : > { %v3865_v1 = vpop.eup %3864  ;;  %v2726_v56 = vadd.f32 %v3749_v8, %v2472_v61  ;;  %v2470_v5 = vadd.f32 %v2433_v50, %v2088_v27  ;;  %v3734_v52 = vpop.f32.mrf.mxu1 }
 0x188   : > { %v2827_v19 = vadd.f32 1.0, %v3865_v1  ;;  %3878 = vpow2.f32 %v3412_v42  ;;  %v3417_v11 = vmul.f32 -1.442695, %v5243_v37  ;;  %v5250_v44 = vadd.f32 %v5169_v17, %v2746_v26  ;;  %v3753_v27 = vpop.f32.mrf.mxu0 }
 0x189   : > { %v3867_v22 = vpop.eup %3866  ;;  %v2749_v62 = vmul.f32 %v5156_v23, %v2726_v56  ;;  %v2724_v36 = vadd.f32 %v2687_v51, %v2470_v5  ;;  %v2475_v21 = vadd.f32 %v3734_v52, %v2093_v29  ;;  %v2446_v57 = vpop.f32.mrf.mxu1 }
 0x18a   : > { %3880 = vrcp.f32 %v2827_v19  ;;  %v2825_v43 = vadd.f32 1.0, %v3867_v22  ;;  %v3415_v10 = vmul.f32 -1.442695, %v5250_v44  ;;  %v2473_v15 = vadd.f32 %v2446_v57, %v2091_v34 }
 0x18b   : > { %v3869_v39 = vpop.eup %3868  ;;  %3882 = vpow2.f32 %v3417_v11  ;;  %v5256_v18 = vadd.f32 %v5169_v17, %v2749_v62  ;;  %v2747_v7 = vmul.f32 %v5156_v23, %v2724_v36  ;;  %v2729_v8 = vadd.f32 %v3752_v6, %v2475_v21  ;;  %v3735_v35 = vpop.f32.mrf.mxu1 }
 0x18c   : > { %3884 = vrcp.f32 %v2825_v43  ;;  %v2828_v2 = vadd.f32 1.0, %v3869_v39  ;;  %v2727_v54 = vadd.f32 %v2700_v13, %v2473_v15  ;;  %v2476_v53 = vadd.f32 %v3735_v35, %v2094_v38  ;;  %v2703_v6 = vpop.f32.mrf.mxu0 }
 0x18d   : > { %v3871_v25 = vpop.eup %3870  ;;  %3886 = vpow2.f32 %v3415_v10  ;;  %v3418_v58 = vmul.f32 -1.442695, %v5256_v18  ;;  %v5261_v20 = vadd.f32 %v5169_v17, %v2747_v7  ;;  %v2752_v51 = vmul.f32 %v5156_v23, %v2729_v8  ;;  %v2449_v45 = vpop.f32.mrf.mxu1 }
 0x18e   : > { %3888 = vrcp.f32 %v2828_v2  ;;  %v2826_v63 = vadd.f32 1.0, %v3871_v25  ;;  %v2750_v12 = vmul.f32 %v5156_v23, %v2727_v54  ;;  %v2730_v49 = vadd.f32 %v3753_v27, %v2476_v53 }
 0x18f   : > { %3890 = vpow2.f32 %v3418_v58  ;;  %v3416_v9 = vmul.f32 -1.442695, %v5261_v20  ;;  %v5267_v46 = vadd.f32 %v5169_v17, %v2752_v51  ;;  %v2474_v47 = vadd.f32 %v2449_v45, %v2092_v60 }
 0x190   : > { %v3873_v14 = vpop.eup %3872  ;;  %3892 = vrcp.f32 %v2826_v63  ;;  %v5270_v24 = vadd.f32 %v5169_v17, %v2750_v12  ;;  %v2753_v48 = vmul.f32 %v5156_v23, %v2730_v49 }
 0x191   : > { %v2831_v31 = vadd.f32 1.0, %v3873_v14  ;;  %3894 = vpow2.f32 %v3416_v9  ;;  %v3421_v29 = vmul.f32 -1.442695, %v5267_v46  ;;  %v2728_v59 = vadd.f32 %v2703_v6, %v2474_v47 }
 0x192   : > { %v3875_v61 = vpop.eup %3874  ;;  %v5275_v50 = vadd.f32 %v5169_v17, %v2753_v48  ;;  %v3419_v1 = vmul.f32 -1.442695, %v5270_v24 }
 0x193   : > { %v3877_v42 = vpop.eup %3876  ;;  %3896 = vrcp.f32 %v2831_v31  ;;  %v2829_v26 = vadd.f32 1.0, %v3875_v61  ;;  %v2751_v3 = vmul.f32 %v5156_v23, %v2728_v59 }
 0x194   : > { %v2832_v34 = vadd.f32 1.0, %v3877_v42  ;;  %3898 = vpow2.f32 %v3421_v29  ;;  %v3422_v38 = vmul.f32 -1.442695, %v5275_v50 }
 0x195   : > { %v3879_v33 = vpop.eup %3878  ;;  %3900 = vrcp.f32 %v2829_v26  ;;  %v5281_v56 = vadd.f32 %v5169_v17, %v2751_v3 }
 0x196   : > { %3902 = vrcp.f32 %v2832_v34  ;;  %v2830_v5 = vadd.f32 1.0, %v3879_v33 }
 0x197   : > { %v3881_v52 = vpop.eup %3880  ;;  %3904 = vpow2.f32 %v3419_v1  ;;  %v3420_v19 = vmul.f32 -1.442695, %v5281_v56 }
 0x198   : > { %v3883_v11 = vpop.eup %3882  ;;  %3906 = vrcp.f32 %v2830_v5  ;;  %v2875_v62 = vmul.f32 %v3881_v52, %v5180_v30 }
 0x199   : > { %v3885_v23 = vpop.eup %3884  ;;  %v2835_v13 = vadd.f32 1.0, %v3883_v11  ;;  %3908 = vpow2.f32 %v3422_v38 }
 0x19a   : > { %v3887_v22 = vpop.eup %3886  ;;  %3910 = vpow2.f32 %v3420_v19  ;;  %v2873_v10 = vmul.f32 %v3885_v23, %v5191_v32 }
 0x19b   : > { %v3889_v55 = vpop.eup %3888  ;;  %v2833_v60 = vadd.f32 1.0, %v3887_v22  ;;  %3912 = vrcp.f32 %v2835_v13 }
 0x19c   : > { %v3891_v17 = vpop.eup %3890  ;;  %v2876_v36 = vmul.f32 %v3889_v55, %v5199_v16 }
 0x19d   : > { %v3893_v21 = vpop.eup %3892  ;;  %v2836_v57 = vadd.f32 1.0, %v3891_v17  ;;  %3914 = vrcp.f32 %v2833_v60 }
 0x19e   : > { %v3895_v43 = vpop.eup %3894  ;;  %v3472_v15 = vpack.c.bf16 %v2876_v36, %v2875_v62  ;;  %v2874_v39 = vmul.f32 %v3893_v21, %v5206_v4 }
 0x19f   : > { %3916 = vrcp.f32 %v2836_v57  ;;  %v2834_v7 = vadd.f32 1.0, %v3895_v43 }
 0x1a0   : > { %v3897_v8 = vpop.eup %3896  ;;  %3504 = vst [vmem:[%s5291_s13 + $0x8] sm:$0xff] %v3472_v15   ;;  %v3467_v30 = vpack.c.bf16 %v2874_v39, %v2873_v10 }
 0x1a1   : > { %v3899_v16 = vpop.eup %3898  ;;  %3918 = vrcp.f32 %v2834_v7  ;;  %v2879_v4 = vmul.f32 %v3897_v8, %v5215_v28 }
 0x1a2   : > { %v3901_v35 = vpop.eup %3900  ;;  %3468 = vst [vmem:[%s5291_s13] sm:$0xff] %v3467_v30   ;;  %v2839_v32 = vadd.f32 1.0, %v3899_v16 }
 0x1a3   : > { %v3903_v2 = vpop.eup %3902  ;;  %v2877_v51 = vmul.f32 %v3901_v35, %v5223_v40 }
 0x1a4   : > { %v3905_v54 = vpop.eup %3904  ;;  %v2880_v53 = vmul.f32 %v3903_v2, %v5226_v0  ;;  %3920 = vrcp.f32 %v2839_v32 }
 0x1a5   : > { %v3907_v27 = vpop.eup %3906  ;;  %v2837_v25 = vadd.f32 1.0, %v3905_v54 }
 0x1a6   : > { %v3909_v58 = vpop.eup %3908  ;;  %v3482_v45 = vpack.c.bf16 %v2880_v53, %v2879_v4  ;;  %v2878_v63 = vmul.f32 %v3907_v27, %v5235_v41 }
 0x1a7   : > { %v3911_v12 = vpop.eup %3910  ;;  %v2840_v49 = vadd.f32 1.0, %v3909_v58  ;;  %3922 = vrcp.f32 %v2837_v25 }
 0x1a8   : > { %3506 = vst [vmem:[%s5291_s13 + $0x18] sm:$0xff] %v3482_v45   ;;  %v3477_v9 = vpack.c.bf16 %v2878_v63, %v2877_v51  ;;  %v2838_v28 = vadd.f32 1.0, %v3911_v12  ;;  %v3913_v0 = vpop.eup %3912 }
 0x1a9   : > { %3924 = vrcp.f32 %v2840_v49  ;;  %v2883_v14 = vmul.f32 %v3913_v0, %v5243_v37 }
 0x1aa   : > { %3505 = vst [vmem:[%s5291_s13 + $0x10] sm:$0xff] %v3477_v9   ;;  %3926 = vrcp.f32 %v2838_v28  ;;  %v3915_v47 = vpop.eup %3914 }
 0x1ab   : > { %v2881_v6 = vmul.f32 %v3915_v47, %v5250_v44 }
 0x1ac   : > { %v3917_v40 = vpop.eup %3916 }
 0x1ad   : > { %v2884_v41 = vmul.f32 %v3917_v40, %v5256_v18 }
 0x1ae   : > { %v3919_v48 = vpop.eup %3918 }
 0x1af   : > { %v3492_v31 = vpack.c.bf16 %v2884_v41, %v2883_v14  ;;  %v2882_v29 = vmul.f32 %v3919_v48, %v5261_v20 }
 0x1b1   : > { %3508 = vst [vmem:[%s5291_s13 + $0x28] sm:$0xff] %v3492_v31   ;;  %v3487_v59 = vpack.c.bf16 %v2882_v29, %v2881_v6  ;;  %v3921_v61 = vpop.eup %3920 }
 0x1b2   : > { %v2887_v44 = vmul.f32 %v3921_v61, %v5267_v46 }
 0x1b3   : > { %3507 = vst [vmem:[%s5291_s13 + $0x20] sm:$0xff] %v3487_v59  }
 0x1b4   : > { %v3923_v37 = vpop.eup %3922 }
 0x1b5   : > { %v2885_v26 = vmul.f32 %v3923_v37, %v5270_v24 }
 0x1b6   : > { %v3925_v42 = vpop.eup %3924 }
 0x1b7   : > { %v3927_v18 = vpop.eup %3926  ;;  %v2888_v20 = vmul.f32 %v3925_v42, %v5275_v50 }
 0x1b8   : > { %v2886_v1 = vmul.f32 %v3927_v18, %v5281_v56 }
 0x1b9   : > { %v3502_v3 = vpack.c.bf16 %v2888_v20, %v2887_v44 }
 0x1ba   : > { %v3497_v34 = vpack.c.bf16 %v2886_v1, %v2885_v26 }
 0x1bb   : > { %3510 = vst [vmem:[%s5291_s13 + $0x38] sm:$0xff] %v3502_v3  }
 0x1bc   : > { %3509 = vst [vmem:[%s5291_s13 + $0x30] sm:$0xff] %v3497_v34  }
 0x1bd   : > { %3941 = shalt.err (!%p3938_p6)
}
 0x1be   : > { %s3942_s11 = scalar_lea.hbm %s5317_s5, 1024  ;;  %s3946_s23 = scalar_lea.hbm %s5380_s4, 4096 }
 0x1bf   : > { %p3943_p7 = scmp.ne.s32.totalorder %s5317_s5, %s3942_s11  ;;  %p3947_p11 = scmp.lt.s32.totalorder %s5317_s5, %s5380_s4 }
 0x1c0   : > { %p3948_p12 = scmp.lt.s32.totalorder %s3946_s23, %s3942_s11 }
 0x1c1   : > { %p3944_p9 = pnand %p3943_p7, %p4101_p3 }
 0x1c2   : > { %p3949_p13 = por %p3948_p12, %p3947_p11 }
 0x1c3   : > { %p3945_p10 = pneg %p3944_p9 }
 0x1c5   : > { %p3950_p0 = pnand %p3949_p13, %p3945_p10 }
 0x1c7   : > { %3953 = shalt.err (!%p3950_p0)
}
 0x1c8   : > { %s4023_s18 = smov 64   ;;  %s4024_s19 = smov 4  }
 0x1c9   : > { %3767 = dma.vmem_to_hbm [thread:$0]  (%p4101_p3), %s5319_s30, 1024, %s5317_s5, %s5325_s6, %s4023_s18, %s4023_s18, %s4024_s19  }
 0x1ca PF: > { %p3773_p1 = scmp.ge.s32.totalorder %s4020_s22, 2  ;;  %s3002_s8 = sand.u32 1, %s3992_s15  }
 0x1cb   : > { %s3003_s9 = scalar_lea.sflag [#allocation3], %s3002_s8 }
 0x1cc   : > { %p3770_p2 = pnand %p3773_p1, %p4110_p8 }
 0x1ce   : > { %p3771_p4 = pneg %p3770_p2 }
 0x1d0   : > { %3987 = dma.done.wait (%p3771_p4), %s3003_s9, 1024  }
 0x1d1   : > { %3989 = vsyncadd (%p3771_p4), %s3003_s9, 4294966272  ;;  %s17_s22 = sadd.s32 1, %s4020_s22   ;;  %s5431_s15 = smov %s3996_s16 }
 0x1d2   : > { %p14_p5 = scmp.ge.s32.totalorder %s17_s22, 6   ;;  %s5432_s16 = smov %s4000_s17 }
 0x1d3   : > { %s5433_s17 = smov %s4119_s7  ;;  %s5434_s18 = smov %s4012_s20 }
 0x1d4   : > { %s5435_s19 = smov %s4016_s21  ;;  %s5436_s20 = smov %s5439_s25 }
 0x1d5   : > { %s5437_s21 = smov %s5443_s26  ;;  %16 = sbr.rel (!%p14_p5) target bundleno = 5 (0x5), region = 91 }
 0x1da   :  { %3008 = vsyncpa [#allocation3], 1 }
 0x1db   :  { %3010 = vsyncpa [#allocation3 + $0x1], 1 }

</bundles_post_ra>
